<compile_context>
chip_gen: v7x
topology: tpu7x:2x2x1
jax: 0.10.0
libtpu: 0.0.40
codegen_flags: <defaults>
</compile_context>

<pallas_src>
import functools
import math

import jax
import jax.numpy as jnp
from jax.experimental import pallas as pl
from jax.experimental.pallas import tpu as pltpu

f32 = jnp.float32
bf16 = jnp.bfloat16


def _round_up(x, m):
    return ((x + m - 1) // m) * m


def _cdiv(a, b):
    return (a + b - 1) // b


def _divisor_tile(total, unit, max_tile):
    """Largest multiple of `unit` that divides `total` and is <= max_tile."""
    n_units = total // unit
    best = 1
    for m in range(1, n_units + 1):
        if n_units % m == 0 and m * unit <= max_tile:
            best = m
    return best * unit


def _tpu_tuning():
    """Return (tq_max, vmem_cap_bytes) for the local TPU generation."""
    try:
        kind = jax.devices()[0].device_kind.lower()
    except Exception:  # pragma: no cover
        kind = ""
    if "v7" in kind:                       # 64 MiB VMEM per TensorCore
        return 256, 56 << 20
    if "v5" in kind or "v6" in kind:       # 128 MiB VMEM
        return 512, 112 << 20
    return 256, 56 << 20                   # unknown: be conservative


def _block_spec(shape, index_map, single_buffer):
    """BlockSpec; constant-index operands get a single pipeline buffer
    (no benefit from double-buffering, saves VMEM)."""
    if single_buffer and hasattr(pl, "Buffered"):
        try:
            return pl.BlockSpec(shape, index_map, pipeline_mode=pl.Buffered(1))
        except TypeError:   # pipeline_mode kwarg not available in this jax
            pass
    return pl.BlockSpec(shape, index_map)


# --------------------------------------------------------------------------
# Kernels
# --------------------------------------------------------------------------
def _kv_proj_kernel(k_ref, v_ref, wk_ref, bk_ref, wv_ref, bv_ref,
                    kp_ref, vp_ref):
    """Project one (batch, encoder-tile) block of keys/values.

    k_ref/v_ref : (1, tk, Hp) bf16    w*_ref : (Hp, Hp) bf16 (in,out)
    b*_ref      : (1, Hp) f32         kp/vp  : (1, tk, Hp) bf16 out
    """
    kp = jnp.dot(k_ref[0], wk_ref[...],
                 preferred_element_type=jnp.float32) + bk_ref[...]
    vp = jnp.dot(v_ref[0], wv_ref[...],
                 preferred_element_type=jnp.float32) + bv_ref[...]
    kp_ref[0] = kp.astype(kp_ref.dtype)
    vp_ref[0] = vp.astype(vp_ref.dtype)


def _attn_kernel(q_ref, kp_ref, vp_ref, wq_ref, bq_ref,
                 ctx_ref, attn_ref, *, enc_len):
    """One (batch, Q-tile) grid step.

    q_ref    : (1, tq,  Hp) bf16   raw decoder tile
    kp_ref   : (1, Tep, Hp) bf16   projected keys   (constant per batch)
    vp_ref   : (1, Tep, Hp) bf16   projected values (constant per batch)
    wq_ref   : (Hp, Hp)     bf16   pre-transposed + 1/sqrt(H)-scaled Q weight
    bq_ref   : (1, Hp)      f32    pre-scaled Q bias
    ctx_ref  : (1, tq,  Hp) f32
    attn_ref : (1, tq, Tep) bf16
    """
    # Q projection (scale already folded into Wq/bq by the wrapper).
    qp = jnp.dot(q_ref[0], wq_ref[...],
                 preferred_element_type=jnp.float32) + bq_ref[...]

    # Scores: contract the hidden dims directly (NT form, no XLU transpose).
    scores = jax.lax.dot_general(
        qp.astype(bf16), kp_ref[0],
        dimension_numbers=(((1,), (1,)), ((), ())),
        preferred_element_type=jnp.float32)

    # Mask padded encoder positions (emitted only when Te was padded to 128).
    if enc_len < scores.shape[-1]:
        enc_ids = jax.lax.broadcasted_iota(jnp.int32, scores.shape, 1)
        scores = jnp.where(enc_ids < enc_len, scores, -jnp.inf)

    # Numerically stable softmax over encoder positions, f32 elementwise.
    # EUP approx reciprocal instead of a VALU divide; its ~1e-3 relative
    # error is below the bf16 quantization of the attn output.
    m = jnp.max(scores, axis=-1, keepdims=True)
    e = jnp.exp(scores - m)
    inv_denom = pl.reciprocal(jnp.sum(e, axis=-1, keepdims=True), approx=True)
    w = e * inv_denom

    attn_ref[0] = w.astype(attn_ref.dtype)
    ctx_ref[0] = jnp.dot(w.astype(bf16), vp_ref[0],
                         preferred_element_type=jnp.float32
                         ).astype(ctx_ref.dtype)


# --------------------------------------------------------------------------
# Wrapper
# --------------------------------------------------------------------------
def scaled_dot_attention(queries, keys, values, params, *, tq_max=None,
                         vmem_limit_bytes=None):
    """queries: (B, Td, H); keys/values: (B, Te, H).

    Returns (context (B, Td, H) f32, attention_weights (B, Td, Te) f32),
    matching the PyTorch ScaledDotAttention forward pass.
    """
    B, Td, H = queries.shape
    _, Te, _ = keys.shape

    auto_tq, vmem_cap = _tpu_tuning()
    if tq_max is None:
        tq_max = auto_tq

    scale = 1.0 / math.sqrt(H)

    # Padding / tiling. Hidden and encoder length padded to the 128-lane
    # width (lane-dense stores, MXU-friendly operands). Decoder axis uses
    # balanced tiles: tq multiple of 16 (bf16 sublane packing), no blind
    # padding up to tq_max.
    Hp = _round_up(H, 128)
    Tep = _round_up(Te, 128)

    n_qt = max(1, _cdiv(Td, tq_max))
    tq = _round_up(_cdiv(Td, n_qt), 16)
    Tdp = tq * n_qt

    tk = _divisor_tile(Tep, 128, 512)      # projection tile along encoder
    n_kt = Tep // tk

    def pad_seq(x, t_pad):
        T = x.shape[1]
        return jnp.pad(x.astype(f32),
                       ((0, 0), (0, t_pad - T), (0, Hp - H))).astype(bf16)

    q_p = pad_seq(queries, Tdp)
    k_p = pad_seq(keys, Tep)
    v_p = pad_seq(values, Tep)

    def pad_w(w, s=1.0):
        # nn.Linear weight (out, in) -> (in, out); optional scale fold; pad.
        wt = w.astype(f32).T * s
        return jnp.pad(wt, ((0, Hp - H), (0, Hp - H))).astype(bf16)

    def pad_b(b, s=1.0):
        return jnp.pad(b.astype(f32) * s, (0, Hp - H))[None, :]

    # Fold the 1/sqrt(H) scale into the Q projection (host side, free).
    wq_t, bq2 = pad_w(params["Wq"], scale), pad_b(params["bq"], scale)
    wk_t, bk2 = pad_w(params["Wk"]), pad_b(params["bk"])
    wv_t, bv2 = pad_w(params["Wv"]), pad_b(params["bv"])

    def _vmem_budget(n_bytes):
        if vmem_limit_bytes is not None:
            return int(vmem_limit_bytes)
        # 1.5x slack for compiler temporaries; never below 32 MiB, never
        # above the generation cap (56 MiB on v7x, 112 MiB on v5e/v6e).
        return int(min(vmem_cap,
                       max(32 << 20, int(1.5 * n_bytes) + (4 << 20))))

    # Conservative per-call VMEM estimates (counted with double buffers so
    # the budget also covers the no-Buffered(1) fallback path).
    kv_vmem = (2 * 2 * tk * Hp * 2             # k/v in
               + 2 * 2 * tk * Hp * 2           # kp/vp out
               + 2 * (2 * Hp * Hp * 2 + 2 * Hp * 4)   # weights + biases
               + 2 * tk * Hp * 4)              # f32 accumulation temporaries
    attn_vmem = (2 * tq * Hp * 2               # q in
                 + 2 * 2 * Tep * Hp * 2        # kp + vp
                 + 2 * (Hp * Hp * 2 + Hp * 4)  # Wq + bq
                 + 2 * tq * Hp * 4             # ctx out
                 + 2 * tq * Tep * 2            # attn out (bf16)
                 + 4 * tq * Tep * 4            # scores / e / w temporaries
                 + tq * Hp * 4)                # qp

    kv_cost = pl.CostEstimate(
        flops=int(4 * B * Tep * Hp * Hp),
        transcendentals=0,
        bytes_accessed=int(4 * B * Tep * Hp * 2 + 2 * Hp * Hp * 2 + 2 * Hp * 4))
    attn_cost = pl.CostEstimate(
        flops=int(2 * B * (Tdp * Hp * Hp + 2 * Tdp * Tep * Hp)),
        transcendentals=int(B * Tdp * Tep),
        bytes_accessed=int(B * (Tdp * Hp * 2 + 2 * Tep * Hp * 2
                                + Tdp * Hp * 4 + Tdp * Tep * 2)
                           + Hp * Hp * 2 + Hp * 4))

    def _run(single_buffer):
        w_spec = _block_spec((Hp, Hp), lambda b, t: (0, 0), single_buffer)
        b_spec = _block_spec((1, Hp), lambda b, t: (0, 0), single_buffer)

        # ---- Pass 1: project K and V once per (batch, encoder tile). -----
        kp, vp = pl.pallas_call(
            _kv_proj_kernel,
            out_shape=(jax.ShapeDtypeStruct((B, Tep, Hp), bf16),
                       jax.ShapeDtypeStruct((B, Tep, Hp), bf16)),
            grid_spec=pltpu.PrefetchScalarGridSpec(
                num_scalar_prefetch=0,
                grid=(B, n_kt),
                in_specs=[
                    pl.BlockSpec((1, tk, Hp), lambda b, t: (b, t, 0)),  # keys
                    pl.BlockSpec((1, tk, Hp), lambda b, t: (b, t, 0)),  # values
                    w_spec, b_spec,                                     # K proj
                    w_spec, b_spec,                                     # V proj
                ],
                out_specs=[
                    pl.BlockSpec((1, tk, Hp), lambda b, t: (b, t, 0)),
                    pl.BlockSpec((1, tk, Hp), lambda b, t: (b, t, 0)),
                ],
            ),
            compiler_params=pltpu.CompilerParams(
                dimension_semantics=("parallel", "parallel"),
                vmem_limit_bytes=_vmem_budget(kv_vmem)),
            cost_estimate=kv_cost,
        )(k_p, v_p, wk_t, bk2, wv_t, bv2)

        # ---- Pass 2: attention. Both grid axes parallel (no carry). ------
        kv_spec = _block_spec((1, Tep, Hp), lambda b, t: (b, 0, 0),
                              single_buffer)
        kernel = functools.partial(_attn_kernel, enc_len=Te)

        context, attn = pl.pallas_call(
            kernel,
            out_shape=(jax.ShapeDtypeStruct((B, Tdp, Hp), f32),
                       jax.ShapeDtypeStruct((B, Tdp, Tep), bf16)),
            grid_spec=pltpu.PrefetchScalarGridSpec(
                num_scalar_prefetch=0,
                grid=(B, n_qt),
                in_specs=[
                    pl.BlockSpec((1, tq, Hp), lambda b, t: (b, t, 0)),  # q
                    kv_spec,                                            # kp
                    kv_spec,                                            # vp
                    w_spec, b_spec,                                     # Q proj
                ],
                out_specs=[
                    pl.BlockSpec((1, tq, Hp), lambda b, t: (b, t, 0)),
                    pl.BlockSpec((1, tq, Tep), lambda b, t: (b, t, 0)),
                ],
            ),
            compiler_params=pltpu.CompilerParams(
                dimension_semantics=("parallel", "parallel"),
                vmem_limit_bytes=_vmem_budget(attn_vmem)),
            cost_estimate=attn_cost,
        )(q_p, kp, vp, wq_t, bq2)

        return (context[:, :Td, :H],
                attn[:, :Td, :Te].astype(f32))

    try:
        out = _run(single_buffer=True)
        jax.block_until_ready(out)      # surface compile/runtime issues here
        return out
    except Exception:
        # Conservative fallback: identical math with default double-buffering
        # (only triggered if Buffered(1) is rejected by this jax/libtpu).
        return _run(single_buffer=False)


# --------------------------------------------------------------------------
# Reference + self-test
# --------------------------------------------------------------------------
def _reference(queries, keys, values, params):
    scale = 1.0 / math.sqrt(queries.shape[-1])
    q = queries @ params["Wq"].T + params["bq"]
    k = keys @ params["Wk"].T + params["bk"]
    v = values @ params["Wv"].T + params["bv"]
    scores = jnp.einsum("bqh,bkh->bqk", q, k) * scale
    w = jax.nn.softmax(scores, axis=-1)
    ctx = jnp.einsum("bqk,bkh->bqh", w, v)
    return ctx, w


if __name__ == "__main__":
    B, DEC, ENC, H = 2, 8, 8, 32

    key = jax.random.PRNGKey(0)
    ks = jax.random.split(key, 9)
    queries = jax.random.normal(ks[0], (B, DEC, H), dtype=jnp.float32)
    keys_ = jax.random.normal(ks[1], (B, ENC, H), dtype=jnp.float32)
    values = jax.random.normal(ks[2], (B, ENC, H), dtype=jnp.float32)

    # Deterministic nn.Linear(hidden, hidden)-shaped parameters.
    bound = 1.0 / math.sqrt(H)
    params = {
        "Wq": jax.random.uniform(ks[3], (H, H), jnp.float32, -bound, bound),
        "bq": jax.random.uniform(ks[4], (H,), jnp.float32, -bound, bound),
        "Wk": jax.random.uniform(ks[5], (H, H), jnp.float32, -bound, bound),
        "bk": jax.random.uniform(ks[6], (H,), jnp.float32, -bound, bound),
        "Wv": jax.random.uniform(ks[7], (H, H), jnp.float32, -bound, bound),
        "bv": jax.random.uniform(ks[8], (H,), jnp.float32, -bound, bound),
    }

    context, attn = scaled_dot_attention(queries, keys_, values, params)
    jax.block_until_ready((context, attn))

    ref_ctx, ref_attn = _reference(queries, keys_, values, params)
    assert context.shape == (B, DEC, H)
    assert attn.shape == (B, DEC, ENC)
    # bf16 MXU inputs, bf16 attn writeback and approx reciprocal are
    # intentional; loosen from the f32 1e-5 bound accordingly.
    assert jnp.allclose(context, ref_ctx, atol=2e-2, rtol=2e-2)
    assert jnp.allclose(attn, ref_attn, atol=2e-2, rtol=2e-2)
    # Attention rows must still be a proper softmax over real encoder steps
    # (within bf16 + approx-reciprocal precision).
    assert jnp.allclose(attn.sum(-1), jnp.ones((B, DEC)), atol=2e-2)

    print("KERNEL_OK")
</pallas_src>

<mosaic_0001>
module attributes {stable_mosaic.version = 11 : i64} {
  func.func @_kv_proj_kernel(%arg0: i32, %arg1: i32, %arg2: memref<1x128x128xbf16, #tpu.memory_space<vmem>>, %arg3: memref<1x128x128xbf16, #tpu.memory_space<vmem>>, %arg4: memref<128x128xbf16, #tpu.memory_space<vmem>>, %arg5: memref<1x128xf32, #tpu.memory_space<vmem>>, %arg6: memref<128x128xbf16, #tpu.memory_space<vmem>>, %arg7: memref<1x128xf32, #tpu.memory_space<vmem>>, %arg8: memref<1x128x128xbf16, #tpu.memory_space<vmem>>, %arg9: memref<1x128x128xbf16, #tpu.memory_space<vmem>>) attributes {dimension_semantics = [#tpu.dimension_semantics<parallel>, #tpu.dimension_semantics<parallel>], iteration_bounds = array<i64: 2, 1>, scalar_prefetch = 0 : i64, scratch_operands = 0 : i64, tpu.core_type = #tpu.core_type<tc>, window_params = [{transform_indices = @transform_0, window_bounds = array<i64: 1, 128, 128>}, {transform_indices = @transform_1, window_bounds = array<i64: 1, 128, 128>}, {pipeline_mode = #tpu.pipeline_mode<synchronous>, transform_indices = @transform_2, window_bounds = array<i64: 128, 128>}, {pipeline_mode = #tpu.pipeline_mode<synchronous>, transform_indices = @transform_3, window_bounds = array<i64: 1, 128>}, {pipeline_mode = #tpu.pipeline_mode<synchronous>, transform_indices = @transform_4, window_bounds = array<i64: 128, 128>}, {pipeline_mode = #tpu.pipeline_mode<synchronous>, transform_indices = @transform_5, window_bounds = array<i64: 1, 128>}, {transform_indices = @transform_6, window_bounds = array<i64: 1, 128, 128>}, {transform_indices = @transform_7, window_bounds = array<i64: 1, 128, 128>}]} {
    %c0 = arith.constant 0 : index
    %c0_0 = arith.constant 0 : index
    %c0_1 = arith.constant 0 : index
    %0 = vector.load %arg2[%c0, %c0_0, %c0_1] : memref<1x128x128xbf16, #tpu.memory_space<vmem>>, vector<1x128x128xbf16>
    %1 = vector.shape_cast %0 : vector<1x128x128xbf16> to vector<128x128xbf16>
    %c0_2 = arith.constant 0 : index
    %c0_3 = arith.constant 0 : index
    %2 = vector.load %arg4[%c0_2, %c0_3] : memref<128x128xbf16, #tpu.memory_space<vmem>>, vector<128x128xbf16>
    %cst = arith.constant dense<0.000000e+00> : vector<128x128xf32>
    %3 = tpu.matmul %1, %2, %cst {dimension_numbers = #tpu.dot_dimension_numbers<[1], [0], [0], [1], [0, 0, 1, 1], [], []>} : vector<128x128xbf16>, vector<128x128xbf16>, vector<128x128xf32> -> vector<128x128xf32>
    %c0_4 = arith.constant 0 : index
    %c0_5 = arith.constant 0 : index
    %4 = vector.load %arg5[%c0_4, %c0_5] : memref<1x128xf32, #tpu.memory_space<vmem>>, vector<1x128xf32>
    %5 = vector.broadcast %4 : vector<1x128xf32> to vector<128x128xf32>
    %6 = arith.addf %3, %5 : vector<128x128xf32>
    %c0_6 = arith.constant 0 : index
    %c0_7 = arith.constant 0 : index
    %c0_8 = arith.constant 0 : index
    %7 = vector.load %arg3[%c0_6, %c0_7, %c0_8] : memref<1x128x128xbf16, #tpu.memory_space<vmem>>, vector<1x128x128xbf16>
    %8 = vector.shape_cast %7 : vector<1x128x128xbf16> to vector<128x128xbf16>
    %c0_9 = arith.constant 0 : index
    %c0_10 = arith.constant 0 : index
    %9 = vector.load %arg6[%c0_9, %c0_10] : memref<128x128xbf16, #tpu.memory_space<vmem>>, vector<128x128xbf16>
    %cst_11 = arith.constant dense<0.000000e+00> : vector<128x128xf32>
    %10 = tpu.matmul %8, %9, %cst_11 {dimension_numbers = #tpu.dot_dimension_numbers<[1], [0], [0], [1], [0, 0, 1, 1], [], []>} : vector<128x128xbf16>, vector<128x128xbf16>, vector<128x128xf32> -> vector<128x128xf32>
    %c0_12 = arith.constant 0 : index
    %c0_13 = arith.constant 0 : index
    %11 = vector.load %arg7[%c0_12, %c0_13] : memref<1x128xf32, #tpu.memory_space<vmem>>, vector<1x128xf32>
    %12 = vector.broadcast %11 : vector<1x128xf32> to vector<128x128xf32>
    %13 = arith.addf %10, %12 : vector<128x128xf32>
    %14 = arith.truncf %6 : vector<128x128xf32> to vector<128x128xbf16>
    %c0_14 = arith.constant 0 : index
    %c0_15 = arith.constant 0 : index
    %c0_16 = arith.constant 0 : index
    %15 = vector.load %arg8[%c0_14, %c0_15, %c0_16] : memref<1x128x128xbf16, #tpu.memory_space<vmem>>, vector<1x128x128xbf16>
    %16 = vector.shape_cast %15 : vector<1x128x128xbf16> to vector<128x128xbf16>
    %17 = vector.shape_cast %14 : vector<128x128xbf16> to vector<1x128x128xbf16>
    tpu.vector_store %arg8[%c0_14, %c0_15, %c0_16], %17 {strides = array<i32>} : memref<1x128x128xbf16, #tpu.memory_space<vmem>>, vector<1x128x128xbf16>,
    %18 = arith.truncf %13 : vector<128x128xf32> to vector<128x128xbf16>
    %c0_17 = arith.constant 0 : index
    %c0_18 = arith.constant 0 : index
    %c0_19 = arith.constant 0 : index
    %19 = vector.load %arg9[%c0_17, %c0_18, %c0_19] : memref<1x128x128xbf16, #tpu.memory_space<vmem>>, vector<1x128x128xbf16>
    %20 = vector.shape_cast %19 : vector<1x128x128xbf16> to vector<128x128xbf16>
    %21 = vector.shape_cast %18 : vector<128x128xbf16> to vector<1x128x128xbf16>
    tpu.vector_store %arg9[%c0_17, %c0_18, %c0_19], %21 {strides = array<i32>} : memref<1x128x128xbf16, #tpu.memory_space<vmem>>, vector<1x128x128xbf16>,
    return
  }
  func.func @transform_0(%arg0: i32, %arg1: i32) -> (i32, i32, i32) {
    %c0_i32 = arith.constant 0 : i32
    %c0_i32_0 = arith.constant 0 : i32
    return %arg0, %arg1, %c0_i32 : i32, i32, i32
  }
  func.func @transform_1(%arg0: i32, %arg1: i32) -> (i32, i32, i32) {
    %c0_i32 = arith.constant 0 : i32
    %c0_i32_0 = arith.constant 0 : i32
    return %arg0, %arg1, %c0_i32 : i32, i32, i32
  }
  func.func @transform_2(%arg0: i32, %arg1: i32) -> (i32, i32) {
    %c0_i32 = arith.constant 0 : i32
    %c0_i32_0 = arith.constant 0 : i32
    %c0_i32_1 = arith.constant 0 : i32
    return %c0_i32, %c0_i32_0 : i32, i32
  }
  func.func @transform_3(%arg0: i32, %arg1: i32) -> (i32, i32) {
    %c0_i32 = arith.constant 0 : i32
    %c0_i32_0 = arith.constant 0 : i32
    %c0_i32_1 = arith.constant 0 : i32
    return %c0_i32, %c0_i32_0 : i32, i32
  }
  func.func @transform_4(%arg0: i32, %arg1: i32) -> (i32, i32) {
    %c0_i32 = arith.constant 0 : i32
    %c0_i32_0 = arith.constant 0 : i32
    %c0_i32_1 = arith.constant 0 : i32
    return %c0_i32, %c0_i32_0 : i32, i32
  }
  func.func @transform_5(%arg0: i32, %arg1: i32) -> (i32, i32) {
    %c0_i32 = arith.constant 0 : i32
    %c0_i32_0 = arith.constant 0 : i32
    %c0_i32_1 = arith.constant 0 : i32
    return %c0_i32, %c0_i32_0 : i32, i32
  }
  func.func @transform_6(%arg0: i32, %arg1: i32) -> (i32, i32, i32) {
    %c0_i32 = arith.constant 0 : i32
    %c0_i32_0 = arith.constant 0 : i32
    return %arg0, %arg1, %c0_i32 : i32, i32, i32
  }
  func.func @transform_7(%arg0: i32, %arg1: i32) -> (i32, i32, i32) {
    %c0_i32 = arith.constant 0 : i32
    %c0_i32_0 = arith.constant 0 : i32
    return %arg0, %arg1, %c0_i32 : i32, i32, i32
  }
}

module attributes {stable_mosaic.version = 11 : i64} {
  func.func @_kv_proj_kernel(%arg0: i32, %arg1: i32, %arg2: memref<1x128x128xbf16, #tpu.memory_space<vmem>>, %arg3: memref<1x128x128xbf16, #tpu.memory_space<vmem>>, %arg4: memref<128x128xbf16, #tpu.memory_space<vmem>>, %arg5: memref<1x128xf32, #tpu.memory_space<vmem>>, %arg6: memref<128x128xbf16, #tpu.memory_space<vmem>>, %arg7: memref<1x128xf32, #tpu.memory_space<vmem>>, %arg8: memref<1x128x128xbf16, #tpu.memory_space<vmem>>, %arg9: memref<1x128x128xbf16, #tpu.memory_space<vmem>>) attributes {dimension_semantics = [#tpu.dimension_semantics<parallel>, #tpu.dimension_semantics<parallel>], iteration_bounds = array<i64: 2, 1>, scalar_prefetch = 0 : i64, scratch_operands = 0 : i64, tpu.core_type = #tpu.core_type<tc>, window_params = [{transform_indices = @transform_0, window_bounds = array<i64: 1, 128, 128>}, {transform_indices = @transform_1, window_bounds = array<i64: 1, 128, 128>}, {pipeline_mode = #tpu.pipeline_mode<synchronous>, transform_indices = @transform_2, window_bounds = array<i64: 128, 128>}, {pipeline_mode = #tpu.pipeline_mode<synchronous>, transform_indices = @transform_3, window_bounds = array<i64: 1, 128>}, {pipeline_mode = #tpu.pipeline_mode<synchronous>, transform_indices = @transform_4, window_bounds = array<i64: 128, 128>}, {pipeline_mode = #tpu.pipeline_mode<synchronous>, transform_indices = @transform_5, window_bounds = array<i64: 1, 128>}, {transform_indices = @transform_6, window_bounds = array<i64: 1, 128, 128>}, {transform_indices = @transform_7, window_bounds = array<i64: 1, 128, 128>}]} {
    %c0 = arith.constant 0 : index
    %c0_0 = arith.constant 0 : index
    %c0_1 = arith.constant 0 : index
    %0 = vector.load %arg2[%c0, %c0_0, %c0_1] : memref<1x128x128xbf16, #tpu.memory_space<vmem>>, vector<1x128x128xbf16>
    %1 = vector.shape_cast %0 : vector<1x128x128xbf16> to vector<128x128xbf16>
    %c0_2 = arith.constant 0 : index
    %c0_3 = arith.constant 0 : index
    %2 = vector.load %arg4[%c0_2, %c0_3] : memref<128x128xbf16, #tpu.memory_space<vmem>>, vector<128x128xbf16>
    %cst = arith.constant dense<0.000000e+00> : vector<128x128xf32>
    %3 = tpu.matmul %1, %2, %cst {dimension_numbers = #tpu.dot_dimension_numbers<[1], [0], [0], [1], [0, 0, 1, 1], [], []>} : vector<128x128xbf16>, vector<128x128xbf16>, vector<128x128xf32> -> vector<128x128xf32>
    %c0_4 = arith.constant 0 : index
    %c0_5 = arith.constant 0 : index
    %4 = vector.load %arg5[%c0_4, %c0_5] : memref<1x128xf32, #tpu.memory_space<vmem>>, vector<1x128xf32>
    %5 = vector.broadcast %4 : vector<1x128xf32> to vector<128x128xf32>
    %6 = arith.addf %3, %5 : vector<128x128xf32>
    %c0_6 = arith.constant 0 : index
    %c0_7 = arith.constant 0 : index
    %c0_8 = arith.constant 0 : index
    %7 = vector.load %arg3[%c0_6, %c0_7, %c0_8] : memref<1x128x128xbf16, #tpu.memory_space<vmem>>, vector<1x128x128xbf16>
    %8 = vector.shape_cast %7 : vector<1x128x128xbf16> to vector<128x128xbf16>
    %c0_9 = arith.constant 0 : index
    %c0_10 = arith.constant 0 : index
    %9 = vector.load %arg6[%c0_9, %c0_10] : memref<128x128xbf16, #tpu.memory_space<vmem>>, vector<128x128xbf16>
    %cst_11 = arith.constant dense<0.000000e+00> : vector<128x128xf32>
    %10 = tpu.matmul %8, %9, %cst_11 {dimension_numbers = #tpu.dot_dimension_numbers<[1], [0], [0], [1], [0, 0, 1, 1], [], []>} : vector<128x128xbf16>, vector<128x128xbf16>, vector<128x128xf32> -> vector<128x128xf32>
    %c0_12 = arith.constant 0 : index
    %c0_13 = arith.constant 0 : index
    %11 = vector.load %arg7[%c0_12, %c0_13] : memref<1x128xf32, #tpu.memory_space<vmem>>, vector<1x128xf32>
    %12 = vector.broadcast %11 : vector<1x128xf32> to vector<128x128xf32>
    %13 = arith.addf %10, %12 : vector<128x128xf32>
    %14 = arith.truncf %6 : vector<128x128xf32> to vector<128x128xbf16>
    %c0_14 = arith.constant 0 : index
    %c0_15 = arith.constant 0 : index
    %c0_16 = arith.constant 0 : index
    %15 = vector.load %arg8[%c0_14, %c0_15, %c0_16] : memref<1x128x128xbf16, #tpu.memory_space<vmem>>, vector<1x128x128xbf16>
    %16 = vector.shape_cast %15 : vector<1x128x128xbf16> to vector<128x128xbf16>
    %17 = vector.shape_cast %14 : vector<128x128xbf16> to vector<1x128x128xbf16>
    tpu.vector_store %arg8[%c0_14, %c0_15, %c0_16], %17 {strides = array<i32>} : memref<1x128x128xbf16, #tpu.memory_space<vmem>>, vector<1x128x128xbf16>,
    %18 = arith.truncf %13 : vector<128x128xf32> to vector<128x128xbf16>
    %c0_17 = arith.constant 0 : index
    %c0_18 = arith.constant 0 : index
    %c0_19 = arith.constant 0 : index
    %19 = vector.load %arg9[%c0_17, %c0_18, %c0_19] : memref<1x128x128xbf16, #tpu.memory_space<vmem>>, vector<1x128x128xbf16>
    %20 = vector.shape_cast %19 : vector<1x128x128xbf16> to vector<128x128xbf16>
    %21 = vector.shape_cast %18 : vector<128x128xbf16> to vector<1x128x128xbf16>
    tpu.vector_store %arg9[%c0_17, %c0_18, %c0_19], %21 {strides = array<i32>} : memref<1x128x128xbf16, #tpu.memory_space<vmem>>, vector<1x128x128xbf16>,
    return
  }
  func.func @transform_0(%arg0: i32, %arg1: i32) -> (i32, i32, i32) {
    %c0_i32 = arith.constant 0 : i32
    %c0_i32_0 = arith.constant 0 : i32
    return %arg0, %arg1, %c0_i32 : i32, i32, i32
  }
  func.func @transform_1(%arg0: i32, %arg1: i32) -> (i32, i32, i32) {
    %c0_i32 = arith.constant 0 : i32
    %c0_i32_0 = arith.constant 0 : i32
    return %arg0, %arg1, %c0_i32 : i32, i32, i32
  }
  func.func @transform_2(%arg0: i32, %arg1: i32) -> (i32, i32) {
    %c0_i32 = arith.constant 0 : i32
    %c0_i32_0 = arith.constant 0 : i32
    %c0_i32_1 = arith.constant 0 : i32
    return %c0_i32, %c0_i32_0 : i32, i32
  }
  func.func @transform_3(%arg0: i32, %arg1: i32) -> (i32, i32) {
    %c0_i32 = arith.constant 0 : i32
    %c0_i32_0 = arith.constant 0 : i32
    %c0_i32_1 = arith.constant 0 : i32
    return %c0_i32, %c0_i32_0 : i32, i32
  }
  func.func @transform_4(%arg0: i32, %arg1: i32) -> (i32, i32) {
    %c0_i32 = arith.constant 0 : i32
    %c0_i32_0 = arith.constant 0 : i32
    %c0_i32_1 = arith.constant 0 : i32
    return %c0_i32, %c0_i32_0 : i32, i32
  }
  func.func @transform_5(%arg0: i32, %arg1: i32) -> (i32, i32) {
    %c0_i32 = arith.constant 0 : i32
    %c0_i32_0 = arith.constant 0 : i32
    %c0_i32_1 = arith.constant 0 : i32
    return %c0_i32, %c0_i32_0 : i32, i32
  }
  func.func @transform_6(%arg0: i32, %arg1: i32) -> (i32, i32, i32) {
    %c0_i32 = arith.constant 0 : i32
    %c0_i32_0 = arith.constant 0 : i32
    return %arg0, %arg1, %c0_i32 : i32, i32, i32
  }
  func.func @transform_7(%arg0: i32, %arg1: i32) -> (i32, i32, i32) {
    %c0_i32 = arith.constant 0 : i32
    %c0_i32_0 = arith.constant 0 : i32
    return %arg0, %arg1, %c0_i32 : i32, i32, i32
  }
}

</mosaic_0001>

<bundles_post_ra>
// kernel: tpu_custom_call.1
= control target key start
LH: loop header
LB: loop body
LE: loop exit
PB: predicated region body
PF: predicated region fallthrough
CT: control target
= control target key end

     0   :  { %s2415_s0 = inlined_call_operand.hbm [shape: bf16[2,128,128], index: 0, kind: input, shape index: {}]   ;;  %s2416_s1 = inlined_call_operand.hbm [shape: bf16[2,128,128], index: 1, kind: input, shape index: {}]   ;;  %s2417_s2 = inlined_call_operand.hbm [shape: bf16[128,128], index: 2, kind: input, shape index: {}]   ;;  %s2418_s3 = inlined_call_operand.vmem [shape: f32[1,128], index: 3, kind: input, shape index: {}]   ;;  %s2419_s4 = inlined_call_operand.hbm [shape: bf16[128,128], index: 4, kind: input, shape index: {}]   ;;  %s2420_s5 = inlined_call_operand.vmem [shape: f32[1,128], index: 5, kind: input, shape index: {}]   ;;  %s2421_s6 = inlined_call_operand.hbm [shape: bf16[2,128,128], index: 6, kind: output, shape index: {0}]   ;;  %s2422_s7 = inlined_call_operand.hbm [shape: bf16[2,128,128], index: 7, kind: output, shape index: {1}]  }
   0x1   :  { %2434 = sst [smem:[#allocation24_spill]] %s2415_s0 }
   0x2   :  { %2435 = sst [smem:[#allocation25_spill]] %s2417_s2 }
   0x3   :  { %2436 = sst [smem:[#allocation26_spill]] %s2419_s4 }
   0x4   :  { %13 = vsyncpa [#allocation3], 0 }
   0x5   :  { %15 = vsyncpa [#allocation3 + $0x1], 0 }
   0x6   :  { %16 = vsyncpa [#allocation6], 0 }
   0x7   :  { %18 = vsyncpa [#allocation6 + $0x1], 0 }
   0x8   :  { %19 = vsyncpa [#allocation9], 0 }
   0x9   :  { %20 = vsyncpa [#allocation4], 0 }
   0xa   :  { %22 = vsyncpa [#allocation4 + $0x1], 0 }
   0xb   :  { %23 = vsyncpa [#allocation12], 0 }
   0xc   :  { %25 = vsyncpa [#allocation12 + $0x1], 0  ;;  %s1978_s24 = smov 0   ;;  %s1980_s25 = smov 0  }
   0xd   :  { %s1982_s26 = smov 0   ;;  %s1984_s27 = smov 0  }
   0xe   :  { %s1986_s28 = smov 0   ;;  %s1988_s29 = smov 0  }
   0xf LB: > { %2437 = sst [smem:[#allocation19_spill]] %s1914_s26  ;;  %s2009_s30 = sadd.s32 4294967295, %s1926_s29   ;;  %s1926_s29 = sphi %s1988_s29, %s31_s29   ;;  %s1922_s28 = sphi %s1986_s28, %s2466_s28   ;;  %s1918_s27 = sphi %s1984_s27, %s2465_s27   ;;  %s1914_s26 = sphi %s1982_s26, %s2469_s26   ;;  %s1910_s25 = sphi %s1980_s25, %s2468_s25   ;;  %s1906_s24 = sphi %s1978_s24, %s2467_s24  }
  0x10   : > { %2438 = sst [smem:[#allocation20_spill]] %s1922_s28  ;;  %s1237_s8 = sadd.s32 4294967294, %s1926_s29  }
  0x11   : > { %p65_p0 = scmp.ne.s32.totalorder %s1910_s25, %s1906_s24  ;;  %p2423_p1 = scmp.eq.s32.totalorder %s2009_s30, 0 }
  0x12   : > { %p209_p3 = scmp.eq.s32.totalorder %s1237_s8, 1  ;;  %p1238_p5 = scmp.ge.s32.totalorder %s1926_s29, 1 }
  0x13   : > { %p2018_p4 = por %p2423_p1, %p65_p0  ;;  %p244_p7 = scmp.lt.s32.totalorder %s1926_s29, 3 }
  0x14   : > { %p2023_p6 = por %p209_p3, %p65_p0  ;;  %s1928_s12 = smov [#allocation7]  }
  0x15   : > { %s2439_s9 = scalar_select %p2018_p4, 1, 0 }
  0x16   : > { %s2440_s10 = scalar_select %p2023_p6, 1, 0 }
  0x17   : > { %p2028_p8 = pnand %p1238_p5, %p244_p7  ;;  %s256_s13 = sshll.u32 %s1928_s12, 4  ;;  %s2032_s13 = int_to_ptr.vmem [resolvable:$true] %s256_s13 }
  0x18   : > { %2441 = sst [smem:[#allocation21_spill]] %s2440_s10  ;;  %s1929_s15 = smov [#allocation8]  }
  0x19   : > { %p1571_p9 = pneg %p2028_p8  ;;  %s272_s16 = sshll.u32 %s1929_s15, 4  ;;  %s2043_s16 = int_to_ptr.vmem [resolvable:$true] %s272_s16 }
  0x1a   : > { %s2444_s2 = sld [smem:[#allocation25_spill]] }
  0x1b   : > { %p2039_p11 = pnand %p1571_p9, %p2423_p1 }
  0x1d   : > { %p1686_p13 = pneg %p2039_p11 }
  0x20   : > { %s1684_s19 = scalar_lea.hbm %s2444_s2, 1024 }
  0x21   : > { %p1685_p12 = scmp.ne.s32.totalorder %s2444_s2, %s1684_s19  ;;  %p1691_p5 = scmp.lt.u32.totalorder %s1684_s19, %s2444_s2 }
  0x23   : > { %p1687_p0 = pnand %p1686_p13, %p1685_p12 }
  0x25   : > { %p1688_p3 = pneg %p1687_p0 }
  0x27   : > { %p1693_p7 = pnand %p1691_p5, %p1688_p3 }
  0x29   : > { %1696 = shalt.err (!%p1693_p7)
}
  0x2a   : > { %s1697_s8 = scalar_lea.vmem %s2032_s13, 1024  ;;  %p1705_p2 = scmp.lt.s32.totalorder %s2032_s13, %s2032_s13 }
  0x2b   : > { %p1698_p9 = scmp.ne.s32.totalorder %s2032_s13, %s1697_s8  ;;  %p1706_p12 = scmp.lt.s32.totalorder %s1697_s8, %s1697_s8 }
  0x2d   : > { %p1700_p10 = pnand %p1698_p9, %p1686_p13  ;;  %p1707_p0 = por %p1706_p12, %p1705_p2 }
  0x2f   : > { %p1701_p1 = pneg %p1700_p10 }
  0x31   : > { %p1708_p6 = pnand %p1707_p0, %p1701_p1 }
  0x33   : > { %1711 = shalt.err (!%p1708_p6)
}
  0x34   : > { %s2425_s12 = smov 64   ;;  %s2427_s15 = smov 4  }
  0x35   : > { %1574 = dma.hbm_to_vmem [thread:$0]  (!%p2039_p11), %s2444_s2, 1024, %s2032_s13, [#allocation6], %s2425_s12, %s2425_s12, %s2427_s15  }
  0x36   : > { %s2445_s4 = sld [smem:[#allocation26_spill]] }
  0x3c   : > { %s1712_s21 = scalar_lea.hbm %s2445_s4, 1024 }
  0x3d   : > { %p1713_p1 = scmp.ne.s32.totalorder %s2445_s4, %s1712_s21  ;;  %p1719_p10 = scmp.lt.u32.totalorder %s1712_s21, %s2445_s4 }
  0x3f   : > { %p1715_p2 = pnand %p1713_p1, %p1686_p13 }
  0x41   : > { %p1716_p6 = pneg %p1715_p2 }
  0x43   : > { %p1721_p3 = pnand %p1719_p10, %p1716_p6 }
  0x45   : > { %1724 = shalt.err (!%p1721_p3)
}
  0x46   : > { %s1725_s13 = scalar_lea.vmem %s2043_s16, 1024  ;;  %p1733_p12 = scmp.lt.s32.totalorder %s2043_s16, %s2043_s16 }
  0x47   : > { %p1726_p5 = scmp.ne.s32.totalorder %s2043_s16, %s1725_s13  ;;  %p1734_p0 = scmp.lt.s32.totalorder %s1725_s13, %s1725_s13 }
  0x49   : > { %p1728_p7 = pnand %p1726_p5, %p1686_p13  ;;  %p1735_p1 = por %p1734_p0, %p1733_p12 }
  0x4b   : > { %p1729_p9 = pneg %p1728_p7 }
  0x4d   : > { %p1736_p2 = pnand %p1735_p1, %p1729_p9 }
  0x4f   : > { %1739 = shalt.err (!%p1736_p2)
}
  0x50   : > { %1577 = dma.hbm_to_vmem [thread:$0]  (!%p2039_p11), %s2445_s4, 1024, %s2043_s16, [#allocation9], %s2425_s12, %s2425_s12, %s2427_s15  }
  0x51   : > { %s43_s14 = sadd.s32 1, %s1922_s28  ;;  %s52_s18 = sadd.s32 1, %s1914_s26 }
  0x52   : > { %p45_p13 = scmp.ge.s32.totalorder %s43_s14, 2  ;;  %p59_p6 = scmp.ne.s32.totalorder %s1914_s26, %s1910_s25 }
  0x53   : > { %p60_p10 = scmp.eq.s32.totalorder %s1926_s29, 0  ;;  %p1594_p3 = scmp.lt.s32.totalorder %s1926_s29, 2 }
  0x54   : > { %s2471_s14 = smov (%p45_p13, %s43_s14), 0  ;;  %p2447_p7 = scmp.eq.s32.totalorder %s2009_s30, 1 }
  0x55   : > { %2446 = sst [smem:[#allocation22_spill]] %s2471_s14  ;;  %p61_p5 = por %p60_p10, %p59_p6 }
  0x56   : > { %p2113_p9 = por %p2447_p7, %p59_p6  ;;  %s47_s20 = ssub.s32 %s1922_s28, %s2471_s14 }
  0x57   : > { %s289_s21 = sand.u32 1, %s1914_s26   ;;  %p50_p12 = scmp.eq.s32.totalorder %s47_s20, 0 }
  0x58   : > { %s2448_s19 = scalar_select %p2113_p9, 1, 0 }
  0x59   : > { %s2120_s16 = sshll.u32 %s289_s21, 6  ;;  %s1329_s22 = sshll.u32 %s1922_s28, 10 }
  0x5a   : > { %s2124_s23 = scalar_select %p50_p12, %s1914_s26, %s52_s18  }
  0x5b   : > { %s2450_s0 = sld [smem:[#allocation24_spill]]  ;;  %s293_s17 = scalar_lea.vmem [#allocation2], %s2120_s16 }
  0x5c   : > { %2449 = sst [smem:[#allocation23_spill]] %s2124_s23  ;;  %s302_s12 = sshll.u32 %s293_s17, 4  ;;  %s2138_s12 = int_to_ptr.vmem [resolvable:$true] %s302_s12 }
  0x5d   : > { %p2134_p11 = pnand %p1594_p3, %p61_p5  ;;  %s2143_s8 = scalar_lea.hbm %s2416_s1, %s1329_s22 }
  0x5e   : > { %s2145_s13 = scalar_lea.sflag [#allocation3], %s289_s21 }
  0x5f   : > { %p1742_p1 = pneg %p2134_p11 }
  0x61   : > { %s2129_s10 = scalar_lea.hbm %s2450_s0, %s1329_s22  ;;  %s1745_s14 = scalar_lea.hbm %s2450_s0, 2048 }
  0x62   : > { %s1740_s2 = scalar_lea.hbm %s2129_s10, 1024  ;;  %p1746_p6 = scmp.lt.u32.totalorder %s2129_s10, %s2450_s0 }
  0x63   : > { %p1741_p0 = scmp.ne.s32.totalorder %s2129_s10, %s1740_s2  ;;  %p1747_p10 = scmp.lt.u32.totalorder %s1745_s14, %s1740_s2 }
  0x64   : > { %p1749_p5 = scmp.lt.u32.totalorder %s1740_s2, %s2129_s10 }
  0x65   : > { %p1743_p2 = pnand %p1742_p1, %p1741_p0  ;;  %p1748_p3 = por %p1747_p10, %p1746_p6 }
  0x67   : > { %p1744_p13 = pneg %p1743_p2  ;;  %p1750_p7 = por %p1749_p5, %p1748_p3 }
  0x69   : > { %p1751_p12 = pnand %p1750_p7, %p1744_p13 }
  0x6b   : > { %1754 = shalt.err (!%p1751_p12)
}
  0x6c   : > { %s1755_s15 = scalar_lea.vmem %s2138_s12, 1024  ;;  %s1932_s4 = smov [#allocation2]  }
  0x6d   : > { %p1756_p0 = scmp.ne.s32.totalorder %s2138_s12, %s1755_s15  ;;  %s1760_s21 = sshll.u32 %s1932_s4, 4  ;;  %s1761_s21 = int_to_ptr.vmem [resolvable:$false] %s1760_s21 }
  0x6e   : > { %s1762_s28 = scalar_lea.vmem %s1761_s21, 2048  ;;  %p1763_p4 = scmp.lt.s32.totalorder %s2138_s12, %s1761_s21 }
  0x6f   : > { %p1758_p2 = pnand %p1756_p0, %p1742_p1  ;;  %p1764_p6 = scmp.lt.s32.totalorder %s1762_s28, %s1755_s15 }
  0x71   : > { %p1759_p9 = pneg %p1758_p2  ;;  %p1765_p10 = por %p1764_p6, %p1763_p4 }
  0x73   : > { %p1766_p3 = pnand %p1765_p10, %p1759_p9 }
  0x75   : > { %1769 = shalt.err (!%p1766_p3)
}
  0x76   : > { %s2452_s2 = smov 4   ;;  %s2453_s14 = smov 64  }
  0x77   : > { %1581 = dma.hbm_to_vmem [thread:$0]  (!%p2134_p11), %s2129_s10, 1024, %s2138_s12, %s2145_s13, %s2453_s14, %s2453_s14, %s2452_s2  }
  0x78   : > { %s316_s22 = scalar_lea.vmem [#allocation5], %s2120_s16  ;;  %s312_s18 = sand.u32 1, %s1926_s29  }
  0x79   : > { %s325_s23 = sshll.u32 %s316_s22, 4  ;;  %s2180_s17 = scalar_lea.sflag [#allocation6], %s312_s18  ;;  %s2178_s23 = int_to_ptr.vmem [resolvable:$true] %s325_s23 }
  0x7a   : > { %s1770_s15 = scalar_lea.hbm %s2143_s8, 1024  ;;  %s1775_s28 = scalar_lea.hbm %s2416_s1, 2048 }
  0x7b   : > { %p1771_p4 = scmp.ne.s32.totalorder %s2143_s8, %s1770_s15  ;;  %p1776_p5 = scmp.lt.u32.totalorder %s2143_s8, %s2416_s1 }
  0x7c   : > { %p1777_p7 = scmp.lt.u32.totalorder %s1775_s28, %s1770_s15  ;;  %p1779_p0 = scmp.lt.u32.totalorder %s1770_s15, %s2143_s8 }
  0x7d   : > { %p1773_p9 = pnand %p1771_p4, %p1742_p1 }
  0x7e   : > { %p1778_p12 = por %p1777_p7, %p1776_p5 }
  0x7f   : > { %p1774_p13 = pneg %p1773_p9 }
  0x80   : > { %p1780_p2 = por %p1779_p0, %p1778_p12 }
  0x82   : > { %p1781_p6 = pnand %p1780_p2, %p1774_p13 }
  0x84   : > { %1784 = shalt.err (!%p1781_p6)
}
  0x85   : > { %s1785_s12 = scalar_lea.vmem %s2178_s23, 1024  ;;  %s1933_s16 = smov [#allocation5]  }
  0x86   : > { %p1786_p10 = scmp.ne.s32.totalorder %s2178_s23, %s1785_s12  ;;  %s1790_s10 = sshll.u32 %s1933_s16, 4  ;;  %s1791_s10 = int_to_ptr.vmem [resolvable:$false] %s1790_s10 }
  0x87   : > { %s1792_s0 = scalar_lea.vmem %s1791_s10, 2048  ;;  %p1793_p9 = scmp.lt.s32.totalorder %s2178_s23, %s1791_s10 }
  0x88   : > { %p1788_p3 = pnand %p1786_p10, %p1742_p1  ;;  %p1794_p5 = scmp.lt.s32.totalorder %s1792_s0, %s1785_s12 }
  0x8a   : > { %p1789_p4 = pneg %p1788_p3  ;;  %p1795_p7 = por %p1794_p5, %p1793_p9 }
  0x8c   : > { %p1796_p12 = pnand %p1795_p7, %p1789_p4 }
  0x8e   : > { %1799 = shalt.err (!%p1796_p12)
}
  0x8f   : > { %1584 = dma.hbm_to_vmem [thread:$0]  (!%p2134_p11), %s2143_s8, 1024, %s2178_s23, %s2180_s17, %s2453_s14, %s2453_s14, %s2452_s2  }
  0x90   : > { %337 = sbr.rel (%p2028_p8) target bundleno = 476 (0x1dc), region = 44  ;;  %s2212_s26 = sand.u32 (!%p2028_p8), 1, %s1910_s25  }
  0x91   : > { %s2215_s13 = sshll.u32 (!%p2028_p8), %s2212_s26, 6  ;;  %s340_s20 = scalar_lea.sflag (!%p2028_p8), [#allocation3], %s2212_s26 }
  0x92   : > { %s2219_s22 = scalar_lea.vmem (!%p2028_p8), [#allocation2], %s2215_s13  ;;  %p2454_p1 = scmp.ne.s32.totalorder (!%p2028_p8), %s2439_s9, 0 }
  0x97   : > { %1881 = dma.done.wait (%p2454_p1), %s340_s20, 1024  }
  0x98   : > { %1883 = vsyncadd (%p2454_p1), %s340_s20, 4294966272  ;;  %s348_s11 = sand.u32 1, %s2009_s30   ;;  %s2227_s2 = scalar_lea.vmem [#allocation5], %s2215_s13 }
  0x99   : > { %s349_s8 = scalar_lea.sflag [#allocation6], %s348_s11 }
  0x9a   : > { %1885 = dma.done.wait (%p2454_p1), %s349_s8, 1024  }
  0x9b   : > { %1887 = vsyncadd (%p2454_p1), %s349_s8, 4294966272  ;;  %p2455_p8 = scmp.eq.s32.totalorder %s2009_s30, 0 }
  0x9d   : > { %1889 = dma.done.wait (%p2455_p8), [#allocation6], 1024   ;;  %p2456_p11 = pmov %p2455_p8 }
  0x9e   : > { %p2457_p13 = pmov %p2455_p8 }
  0x9f   : > { %1891 = vsyncadd (%p2456_p11), [#allocation6], 4294966272 }
  0xa0   : > { %1893 = dma.done.wait (%p2457_p13), [#allocation9], 1024   ;;  %p2458_p0 = pmov %p2455_p8 }
  0xa1   : > { %v1652_v0 = vld [vmem:[#allocation7] sm:$0xff]   ;;  %v1654_v2 = vld [vmem:[#allocation7 + $0x8] sm:$0xff]   ;;  %v1656_v4 = vld [vmem:[#allocation7 + $0x10] sm:$0xff]   ;;  %s2276_s18 = scalar_lea.vmem [#allocation10], %s2215_s13  ;;  %s2280_s17 = scalar_lea.vmem [#allocation11], %s2215_s13 }
  0xa2   : > { %1895 = vsyncadd (%p2458_p0), [#allocation9], 4294966272  ;;  %v1653_v1 = vld [vmem:[#allocation8] sm:$0xff]   ;;  %1491 = vmatprep.subr.bf16.mxu0 %v1652_v0  ;;  %v1655_v3 = vld [vmem:[#allocation8 + $0x8] sm:$0xff]   ;;  %s1051_s15 = sshll.u32 %s2276_s18, 4  ;;  %s1069_s4 = sshll.u32 %s2280_s17, 4  ;;  %s2314_s15 = int_to_ptr.vmem [resolvable:$true] %s1051_s15  ;;  %s2316_s4 = int_to_ptr.vmem [resolvable:$true] %s1069_s4 }
  0xa3   : > { %1523 = vmatprep.subr.bf16.mxu1 %v1653_v1  ;;  %1492 = vmatpush3.bf16.msra.mxu0 %v1652_v0  ;;  %v1657_v5 = vld [vmem:[#allocation8 + $0x10] sm:$0xff]   ;;  %v1658_v6 = vld [vmem:[#allocation7 + $0x18] sm:$0xff]   ;;  %v1660_v8 = vld [vmem:[#allocation7 + $0x20] sm:$0xff]   ;;  %s1363_s21 = sshll.u32 %s1918_s27, 10  ;;  %s1031_s13 = scalar_lea.sflag [#allocation4], %s2212_s26 }
  0xa4   : > { %1524 = vmatpush3.bf16.msra.mxu1 %v1653_v1  ;;  %1493 = vmatprep.subr.bf16.mxu0 %v1654_v2  ;;  %v1659_v7 = vld [vmem:[#allocation8 + $0x18] sm:$0xff]   ;;  %v1661_v9 = vld [vmem:[#allocation8 + $0x20] sm:$0xff]   ;;  %v1662_v10 = vld [vmem:[#allocation7 + $0x28] sm:$0xff]   ;;  %s2327_s12 = scalar_lea.hbm %s2421_s6, %s1363_s21  ;;  %s2333_s0 = scalar_lea.hbm %s2422_s7, %s1363_s21 }
  0xa5   : > { %1525 = vmatprep.subr.bf16.mxu1 %v1655_v3  ;;  %v1663_v11 = vld [vmem:[#allocation8 + $0x28] sm:$0xff]   ;;  %v1668_v12 = vld [vmem:[%s2219_s22] sm:$0xff]   ;;  %v1664_v14 = vld [vmem:[#allocation7 + $0x30] sm:$0xff]   ;;  %s1800_s20 = scalar_lea.vmem %s2314_s15, 1024  ;;  %p2459_p6 = scmp.ne.s32.totalorder %s2448_s19, 0 }
  0xa6   : > { %v1669_v13 = vld [vmem:[%s2227_s2] sm:$0xff]   ;;  %1507 = vmatprep.mubr.bf16.mxu0 %v1668_v12  ;;  %v1665_v15 = vld [vmem:[#allocation8 + $0x30] sm:$0xff]   ;;  %v1666_v16 = vld [vmem:[#allocation7 + $0x38] sm:$0xff]   ;;  %p1801_p2 = scmp.ne.s32.totalorder %s2314_s15, %s1800_s20 }
  0xa7   : > { %1494 = vmatpush3.bf16.msra.mxu0 %v1654_v2  ;;  %1539 = vmatprep.mubr.bf16.mxu1 %v1669_v13  ;;  %v1667_v17 = vld [vmem:[#allocation8 + $0x38] sm:$0xff]   ;;  %v1670_v18 = vld [vmem:[%s2219_s22 + $0x8] sm:$0xff]   ;;  %v1672_v20 = vld [vmem:[%s2219_s22 + $0x10] sm:$0xff]  }
  0xa8   : > { %1526 = vmatpush3.bf16.msra.mxu1 %v1655_v3  ;;  %1495 = vmatprep.subr.bf16.mxu0 %v1656_v4  ;;  %v1671_v19 = vld [vmem:[%s2227_s2 + $0x8] sm:$0xff]   ;;  %v1673_v21 = vld [vmem:[%s2227_s2 + $0x10] sm:$0xff]   ;;  %v1674_v22 = vld [vmem:[%s2219_s22 + $0x18] sm:$0xff]   ;;  %p1802_p10 = pnand %p1801_p2, %p2459_p6 }
  0xa9   : > { %1527 = vmatprep.subr.bf16.mxu1 %v1657_v5  ;;  %v1675_v23 = vld [vmem:[%s2227_s2 + $0x18] sm:$0xff]   ;;  %v1676_v24 = vld [vmem:[%s2219_s22 + $0x20] sm:$0xff]   ;;  %v1678_v26 = vld [vmem:[%s2219_s22 + $0x28] sm:$0xff]  }
  0xaa   : > { %v1677_v25 = vld [vmem:[%s2227_s2 + $0x20] sm:$0xff]   ;;  %v1679_v27 = vld [vmem:[%s2227_s2 + $0x28] sm:$0xff]   ;;  %v1680_v28 = vld [vmem:[%s2219_s22 + $0x30] sm:$0xff]   ;;  %p1803_p3 = pneg %p1802_p10 }
  0xab   : > { %1496 = vmatpush3.bf16.msra.mxu0 %v1656_v4  ;;  %v1681_v29 = vld [vmem:[%s2227_s2 + $0x30] sm:$0xff]   ;;  %v1682_v30 = vld [vmem:[%s2219_s22 + $0x38] sm:$0xff]   ;;  %v2260_v33 = vld [vmem:[%s2418_s3] ss:$0 sm:$0xff]  ;;  %s1934_s22 = smov [#allocation10]  }
  0xac   : > { %1528 = vmatpush3.bf16.msra.mxu1 %v1657_v5  ;;  %1497 = vmatprep.subr.bf16.mxu0 %v1658_v6  ;;  %v1683_v31 = vld [vmem:[%s2227_s2 + $0x38] sm:$0xff]   ;;  %v2265_v35 = vld [vmem:[%s2420_s5] ss:$0 sm:$0xff]  ;;  %s1804_s11 = sshll.u32 %s1934_s22, 4  ;;  %s1805_s11 = int_to_ptr.vmem [resolvable:$false] %s1804_s11 }
  0xad   : > { %1529 = vmatprep.subr.bf16.mxu1 %v1659_v7  ;;  %s1806_s8 = scalar_lea.vmem %s1805_s11, 2048  ;;  %p1807_p4 = scmp.lt.s32.totalorder %s2314_s15, %s1805_s11 }
  0xae   : > { %p1808_p9 = scmp.lt.s32.totalorder %s1806_s8, %s1800_s20 }
  0xaf   : > { %1498 = vmatpush3.bf16.msra.mxu0 %v1658_v6 }
  0xb0   : > { %1530 = vmatpush3.bf16.msra.mxu1 %v1659_v7  ;;  %1499 = vmatprep.subr.bf16.mxu0 %v1660_v8  ;;  %p1809_p5 = por %p1808_p9, %p1807_p4 }
  0xb1   : > { %1531 = vmatprep.subr.bf16.mxu1 %v1661_v9 }
  0xb2   : > { %p1810_p7 = pnand %p1809_p5, %p1803_p3 }
  0xb3   : > { %1500 = vmatpush3.bf16.msra.mxu0 %v1660_v8 }
  0xb4   : > { %1532 = vmatpush3.bf16.msra.mxu1 %v1661_v9  ;;  %1501 = vmatprep.subr.bf16.mxu0 %v1662_v10 }
  0xb5   : > { %1533 = vmatprep.subr.bf16.mxu1 %v1663_v11 }
  0xb7   : > { %1502 = vmatpush3.bf16.msra.mxu0 %v1662_v10 }
  0xb8   : > { %1534 = vmatpush3.bf16.msra.mxu1 %v1663_v11  ;;  %1503 = vmatprep.subr.bf16.mxu0 %v1664_v14 }
  0xb9   : > { %1535 = vmatprep.subr.bf16.mxu1 %v1665_v15 }
  0xbb   : > { %1504 = vmatpush3.bf16.msra.mxu0 %v1664_v14 }
  0xbc   : > { %1536 = vmatpush3.bf16.msra.mxu1 %v1665_v15  ;;  %1505 = vmatprep.subr.bf16.mxu0 %v1666_v16 }
  0xbd   : > { %1537 = vmatprep.subr.bf16.mxu1 %v1667_v17 }
  0xbf   : > { %1506 = vmatpush3.bf16.msra.mxu0 %v1666_v16 }
  0xc0   : > { %1538 = vmatpush3.bf16.msra.mxu1 %v1667_v17 }
  0xc2   : > { %1508 = vmatmul.mubr.bf16.vlgmr.msra.gmra.mrb[0].mxu0 %v1670_v18 }
  0xc3   : > { %1540 = vmatmul.mubr.bf16.vlgmr.msra.gmra.mrb[0].mxu1 %v1671_v19  ;;  %1511 = vmatprep.mubr.bf16.mxu0 %v1672_v20 }
  0xc4   : > { %1543 = vmatprep.mubr.bf16.mxu1 %v1673_v21 }
  0xca   : > { %1512 = vmatmul.mubr.bf16.gmra.mrb[4].mxu0 %v1674_v22 }
  0xcb   : > { %1544 = vmatmul.mubr.bf16.gmra.mrb[4].mxu1 %v1675_v23  ;;  %1515 = vmatprep.mubr.bf16.mxu0 %v1676_v24 }
  0xcc   : > { %1547 = vmatprep.mubr.bf16.mxu1 %v1677_v25 }
  0xd2   : > { %1516 = vmatmul.mubr.bf16.gmra.mrb[8].mxu0 %v1678_v26 }
  0xd3   : > { %1548 = vmatmul.mubr.bf16.gmra.mrb[8].mxu1 %v1679_v27  ;;  %1519 = vmatprep.mubr.bf16.mxu0 %v1680_v28 }
  0xd4   : > { %1551 = vmatprep.mubr.bf16.mxu1 %v1681_v29 }
  0xda   : > { %1520 = vmatmul.mubr.bf16.gmra.mrb[12].mxu0 %v1682_v30 }
  0xdb   : > { %1552 = vmatmul.mubr.bf16.gmra.mrb[12].mxu1 %v1683_v31 }
 0x195   : > { %v1509_v32 = vpop.f32.mrb[0].mxu0 }
 0x196   : > { %v1541_v34 = vpop.f32.mrb[0].mxu1  ;;  %v575_v36 = vpop.f32.mrb[1].mxu0  ;;  %v584_v39 = vadd.f32 %v1509_v32, %v2260_v33 }
 0x197   : > { %v807_v37 = vpop.f32.mrb[1].mxu1  ;;  %v1510_v38 = vpop.f32.mrb[2].mxu0  ;;  %v816_v43 = vadd.f32 %v1541_v34, %v2265_v35  ;;  %v576_v44 = vadd.f32 %v2260_v33, %v575_v36 }
 0x198   : > { %v587_v40 = vadd.f32 %v1510_v38, %v2260_v33  ;;  %v1542_v41 = vpop.f32.mrb[2].mxu1  ;;  %v578_v42 = vpop.f32.mrb[3].mxu0  ;;  %v808_v48 = vadd.f32 %v2265_v35, %v807_v37 }
 0x199   : > { %v819_v45 = vadd.f32 %v1542_v41, %v2265_v35  ;;  %v579_v46 = vadd.f32 %v2260_v33, %v578_v42  ;;  %v810_v47 = vpop.f32.mrb[3].mxu1 }
 0x19a   : > { %v1373_v49 = vpack.c.bf16 %v587_v40, %v584_v39  ;;  %v811_v50 = vadd.f32 %v2265_v35, %v810_v47 }
 0x19b   : > { %v1413_v51 = vpack.c.bf16 %v819_v45, %v816_v43  ;;  %v1368_v52 = vpack.c.bf16 %v579_v46, %v576_v44 }
 0x19c   : > { %1445 = vst [vmem:[%s2276_s18 + $0x8] sm:$0xff] %v1373_v49   ;;  %v1408_v53 = vpack.c.bf16 %v811_v50, %v808_v48 }
 0x19d   : > { %1452 = vst [vmem:[%s2280_s17 + $0x8] sm:$0xff] %v1413_v51   ;;  %1369 = vst [vmem:[%s2276_s18] sm:$0xff] %v1368_v52   ;;  %v1513_v54 = vpop.f32.mrb[4].mxu0 }
 0x19e   : > { %1409 = vst [vmem:[%s2280_s17] sm:$0xff] %v1408_v53   ;;  %v1545_v55 = vpop.f32.mrb[4].mxu1  ;;  %v591_v56 = vpop.f32.mrb[5].mxu0  ;;  %v600_v59 = vadd.f32 %v1513_v54, %v2260_v33 }
 0x19f   : > { %v823_v57 = vpop.f32.mrb[5].mxu1  ;;  %v1514_v58 = vpop.f32.mrb[6].mxu0  ;;  %v832_v63 = vadd.f32 %v1545_v55, %v2265_v35  ;;  %v592_v0 = vadd.f32 %v2260_v33, %v591_v56 }
 0x1a0   : > { %v603_v60 = vadd.f32 %v1514_v58, %v2260_v33  ;;  %v1546_v61 = vpop.f32.mrb[6].mxu1  ;;  %v594_v62 = vpop.f32.mrb[7].mxu0  ;;  %v824_v4 = vadd.f32 %v2265_v35, %v823_v57 }
 0x1a1   : > { %v835_v1 = vadd.f32 %v1546_v61, %v2265_v35  ;;  %v595_v2 = vadd.f32 %v2260_v33, %v594_v62  ;;  %v826_v3 = vpop.f32.mrb[7].mxu1 }
 0x1a2   : > { %v1383_v5 = vpack.c.bf16 %v603_v60, %v600_v59  ;;  %v827_v6 = vadd.f32 %v2265_v35, %v826_v3 }
 0x1a3   : > { %v1423_v7 = vpack.c.bf16 %v835_v1, %v832_v63  ;;  %v1378_v8 = vpack.c.bf16 %v595_v2, %v592_v0 }
 0x1a4   : > { %1447 = vst [vmem:[%s2276_s18 + $0x18] sm:$0xff] %v1383_v5   ;;  %v1418_v9 = vpack.c.bf16 %v827_v6, %v824_v4 }
 0x1a5   : > { %1454 = vst [vmem:[%s2280_s17 + $0x18] sm:$0xff] %v1423_v7   ;;  %1446 = vst [vmem:[%s2276_s18 + $0x10] sm:$0xff] %v1378_v8   ;;  %v1517_v10 = vpop.f32.mrb[8].mxu0 }
 0x1a6   : > { %1453 = vst [vmem:[%s2280_s17 + $0x10] sm:$0xff] %v1418_v9   ;;  %v1549_v11 = vpop.f32.mrb[8].mxu1  ;;  %v607_v12 = vpop.f32.mrb[9].mxu0  ;;  %v616_v15 = vadd.f32 %v1517_v10, %v2260_v33 }
 0x1a7   : > { %v839_v13 = vpop.f32.mrb[9].mxu1  ;;  %v1518_v14 = vpop.f32.mrb[10].mxu0  ;;  %v848_v19 = vadd.f32 %v1549_v11, %v2265_v35  ;;  %v608_v20 = vadd.f32 %v2260_v33, %v607_v12 }
 0x1a8   : > { %v619_v16 = vadd.f32 %v1518_v14, %v2260_v33  ;;  %v1550_v17 = vpop.f32.mrb[10].mxu1  ;;  %v610_v18 = vpop.f32.mrb[11].mxu0  ;;  %v840_v24 = vadd.f32 %v2265_v35, %v839_v13 }
 0x1a9   : > { %v851_v21 = vadd.f32 %v1550_v17, %v2265_v35  ;;  %v611_v22 = vadd.f32 %v2260_v33, %v610_v18  ;;  %v842_v23 = vpop.f32.mrb[11].mxu1 }
 0x1aa   : > { %v1393_v25 = vpack.c.bf16 %v619_v16, %v616_v15  ;;  %v843_v26 = vadd.f32 %v2265_v35, %v842_v23 }
 0x1ab   : > { %v1433_v27 = vpack.c.bf16 %v851_v21, %v848_v19  ;;  %v1388_v28 = vpack.c.bf16 %v611_v22, %v608_v20 }
 0x1ac   : > { %1449 = vst [vmem:[%s2276_s18 + $0x28] sm:$0xff] %v1393_v25   ;;  %v1428_v29 = vpack.c.bf16 %v843_v26, %v840_v24 }
 0x1ad   : > { %1456 = vst [vmem:[%s2280_s17 + $0x28] sm:$0xff] %v1433_v27   ;;  %1448 = vst [vmem:[%s2276_s18 + $0x20] sm:$0xff] %v1388_v28   ;;  %v1521_v30 = vpop.f32.mrb[12].mxu0 }
 0x1ae   : > { %1455 = vst [vmem:[%s2280_s17 + $0x20] sm:$0xff] %v1428_v29   ;;  %v1553_v31 = vpop.f32.mrb[12].mxu1  ;;  %v623_v32 = vpop.f32.mrb[13].mxu0  ;;  %v632_v37 = vadd.f32 %v1521_v30, %v2260_v33 }
 0x1af   : > { %v855_v34 = vpop.f32.mrb[13].mxu1  ;;  %v1522_v36 = vpop.f32.mrb[14].mxu0  ;;  %v864_v41 = vadd.f32 %v1553_v31, %v2265_v35  ;;  %v624_v42 = vadd.f32 %v2260_v33, %v623_v32 }
 0x1b0   : > { %v635_v38 = vadd.f32 %v1522_v36, %v2260_v33  ;;  %v1554_v39 = vpop.f32.mrb[14].mxu1  ;;  %v626_v40 = vpop.f32.mrb[15].mxu0  ;;  %v856_v46 = vadd.f32 %v2265_v35, %v855_v34 }
 0x1b1   : > { %v867_v43 = vadd.f32 %v1554_v39, %v2265_v35  ;;  %v627_v44 = vadd.f32 %v2260_v33, %v626_v40  ;;  %v858_v45 = vpop.f32.mrb[15].mxu1 }
 0x1b2   : > { %v1403_v47 = vpack.c.bf16 %v635_v38, %v632_v37  ;;  %v859_v48 = vadd.f32 %v2265_v35, %v858_v45 }
 0x1b3   : > { %v1443_v49 = vpack.c.bf16 %v867_v43, %v864_v41  ;;  %v1398_v50 = vpack.c.bf16 %v627_v44, %v624_v42 }
 0x1b4   : > { %1451 = vst [vmem:[%s2276_s18 + $0x38] sm:$0xff] %v1403_v47   ;;  %v1438_v51 = vpack.c.bf16 %v859_v48, %v856_v46 }
 0x1b5   : > { %1458 = vst [vmem:[%s2280_s17 + $0x38] sm:$0xff] %v1443_v49   ;;  %1450 = vst [vmem:[%s2276_s18 + $0x30] sm:$0xff] %v1398_v50  }
 0x1b6   : > { %1457 = vst [vmem:[%s2280_s17 + $0x30] sm:$0xff] %v1438_v51  }
 0x1b7   : > { %1813 = shalt.err (!%p1810_p7)
}
 0x1b8   : > { %s1814_s2 = scalar_lea.hbm %s2327_s12, 1024  ;;  %s1818_s14 = scalar_lea.hbm %s2421_s6, 2048 }
 0x1b9   : > { %p1815_p12 = scmp.ne.s32.totalorder %s2327_s12, %s1814_s2  ;;  %p1819_p11 = scmp.lt.u32.totalorder %s2327_s12, %s2421_s6 }
 0x1ba   : > { %p1820_p13 = scmp.lt.u32.totalorder %s1818_s14, %s1814_s2  ;;  %p1822_p2 = scmp.lt.u32.totalorder %s1814_s2, %s2327_s12 }
 0x1bb   : > { %p1816_p1 = pnand %p1815_p12, %p2459_p6 }
 0x1bc   : > { %p1821_p0 = por %p1820_p13, %p1819_p11 }
 0x1bd   : > { %p1817_p8 = pneg %p1816_p1 }
 0x1be   : > { %p1823_p10 = por %p1822_p2, %p1821_p0 }
 0x1c0   : > { %p1824_p3 = pnand %p1823_p10, %p1817_p8 }
 0x1c2   : > { %1827 = shalt.err (!%p1824_p3)
}
 0x1c3   : > { %s1935_s17 = smov 64   ;;  %s1936_s21 = smov 4  }
 0x1c4   : > { %1567 = dma.vmem_to_hbm [thread:$0]  (%p2459_p6), %s2314_s15, 1024, %s2327_s12, %s1031_s13, %s1935_s17, %s1935_s17, %s1936_s21  }
 0x1c5   : > { %s1036_s27 = scalar_lea.sflag [#allocation12], %s2212_s26  ;;  %s1828_s28 = scalar_lea.vmem %s2316_s4, 1024 }
 0x1c6   : > { %p1829_p4 = scmp.ne.s32.totalorder %s2316_s4, %s1828_s28  ;;  %s1937_s16 = smov [#allocation11]  }
 0x1c7   : > { %s1832_s10 = sshll.u32 %s1937_s16, 4  ;;  %s1833_s10 = int_to_ptr.vmem [resolvable:$false] %s1832_s10 }
 0x1c8   : > { %p1830_p9 = pnand %p1829_p4, %p2459_p6  ;;  %s1834_s20 = scalar_lea.vmem %s1833_s10, 2048 }
 0x1c9   : > { %p1835_p7 = scmp.lt.s32.totalorder %s2316_s4, %s1833_s10  ;;  %p1836_p12 = scmp.lt.s32.totalorder %s1834_s20, %s1828_s28 }
 0x1ca   : > { %p1831_p5 = pneg %p1830_p9 }
 0x1cb   : > { %p1837_p1 = por %p1836_p12, %p1835_p7 }
 0x1cd   : > { %p1838_p8 = pnand %p1837_p1, %p1831_p5 }
 0x1cf   : > { %1841 = shalt.err (!%p1838_p8)
}
 0x1d0   : > { %s1842_s15 = scalar_lea.hbm %s2333_s0, 1024  ;;  %s1846_s22 = scalar_lea.hbm %s2422_s7, 2048 }
 0x1d1   : > { %p1843_p11 = scmp.ne.s32.totalorder %s2333_s0, %s1842_s15  ;;  %p1847_p2 = scmp.lt.u32.totalorder %s2333_s0, %s2422_s7 }
 0x1d2   : > { %p1848_p10 = scmp.lt.u32.totalorder %s1846_s22, %s1842_s15  ;;  %p1850_p4 = scmp.lt.u32.totalorder %s1842_s15, %s2333_s0 }
 0x1d3   : > { %p1844_p13 = pnand %p1843_p11, %p2459_p6 }
 0x1d4   : > { %p1849_p3 = por %p1848_p10, %p1847_p2 }
 0x1d5   : > { %p1845_p0 = pneg %p1844_p13 }
 0x1d6   : > { %p1851_p9 = por %p1850_p4, %p1849_p3 }
 0x1d8   : > { %p1852_p5 = pnand %p1851_p9, %p1845_p0 }
 0x1da   : > { %1855 = shalt.err (!%p1852_p5)
}
 0x1db   : > { %1568 = dma.vmem_to_hbm [thread:$0]  (%p2459_p6), %s2316_s4, 1024, %s2333_s0, %s1036_s27, %s1935_s17, %s1935_s17, %s1936_s21  }
 0x1dc PF: > { %s2460_s2 = sld [smem:[#allocation21_spill]]  ;;  %s1084_s30 = sand.u32 1, %s1906_s24  }
 0x1dd   : > { %p2462_p12 = scmp.ge.s32.totalorder %s1926_s29, 2  ;;  %s1085_s9 = scalar_lea.sflag [#allocation4], %s1084_s30 }
 0x1e2   : > { %p2461_p7 = scmp.ne.s32.totalorder %s2460_s2, 0 }
 0x1e4   : > { %p1586_p1 = pnand %p2462_p12, %p2461_p7 }
 0x1e6   : > { %1897 = dma.done.wait (!%p1586_p1), %s1085_s9, 1024  }
 0x1e7   : > { %1899 = vsyncadd (!%p1586_p1), %s1085_s9, 4294966272  ;;  %s1094_s19 = scalar_lea.sflag [#allocation12], %s1084_s30 }
 0x1e8   : > { %1901 = dma.done.wait (!%p1586_p1), %s1094_s19, 1024  }
 0x1e9   : > { %1903 = vsyncadd (!%p1586_p1), %s1094_s19, 4294966272  ;;  %s31_s29 = sadd.s32 1, %s1926_s29   ;;  %s2463_s26 = sld [smem:[#allocation19_spill]] }
 0x1ea   : > { %p28_p8 = scmp.ge.s32.totalorder %s31_s29, 4   ;;  %s2464_s4 = sld [smem:[#allocation23_spill]] }
 0x1eb   : > { %s2465_s27 = sld [smem:[#allocation20_spill]]  ;;  %s2466_s28 = sld [smem:[#allocation22_spill]] }
 0x1ec   : > { %s2467_s24 = smov %s1910_s25  ;;  %30 = sbr.rel (!%p28_p8) target bundleno = 15 (0xf), region = 127 }
 0x1ef   : > { %s2468_s25 = smov %s2463_s26 }
 0x1f0   : > { %s2469_s26 = smov %s2464_s4 }
 0x1f3   :  { %1099 = vsyncpa [#allocation3], 1 }
 0x1f4   :  { %1101 = vsyncpa [#allocation3 + $0x1], 1 }
 0x1f5   :  { %1102 = vsyncpa [#allocation6], 1 }
 0x1f6   :  { %1104 = vsyncpa [#allocation6 + $0x1], 1 }
 0x1f7   :  { %1105 = vsyncpa [#allocation9], 1 }
 0x1f8   :  { %1106 = vsyncpa [#allocation4], 1 }
 0x1f9   :  { %1108 = vsyncpa [#allocation4 + $0x1], 1 }
 0x1fa   :  { %1109 = vsyncpa [#allocation12], 1 }
 0x1fb   :  { %1111 = vsyncpa [#allocation12 + $0x1], 1 }

// kernel: tpu_custom_call.1
= control target key start
LH: loop header
LB: loop body
LE: loop exit
PB: predicated region body
PF: predicated region fallthrough
CT: control target
= control target key end

     0   :  { %s2415_s0 = inlined_call_operand.hbm [shape: bf16[2,128,128], index: 0, kind: input, shape index: {}]   ;;  %s2416_s1 = inlined_call_operand.hbm [shape: bf16[2,128,128], index: 1, kind: input, shape index: {}]   ;;  %s2417_s2 = inlined_call_operand.hbm [shape: bf16[128,128], index: 2, kind: input, shape index: {}]   ;;  %s2418_s3 = inlined_call_operand.vmem [shape: f32[1,128], index: 3, kind: input, shape index: {}]   ;;  %s2419_s4 = inlined_call_operand.hbm [shape: bf16[128,128], index: 4, kind: input, shape index: {}]   ;;  %s2420_s5 = inlined_call_operand.vmem [shape: f32[1,128], index: 5, kind: input, shape index: {}]   ;;  %s2421_s6 = inlined_call_operand.hbm [shape: bf16[2,128,128], index: 6, kind: output, shape index: {0}]   ;;  %s2422_s7 = inlined_call_operand.hbm [shape: bf16[2,128,128], index: 7, kind: output, shape index: {1}]  }
   0x1   :  { %2434 = sst [smem:[#allocation24_spill]] %s2415_s0 }
   0x2   :  { %2435 = sst [smem:[#allocation25_spill]] %s2417_s2 }
   0x3   :  { %2436 = sst [smem:[#allocation26_spill]] %s2419_s4 }
   0x4   :  { %13 = vsyncpa [#allocation3], 0 }
   0x5   :  { %15 = vsyncpa [#allocation3 + $0x1], 0 }
   0x6   :  { %16 = vsyncpa [#allocation6], 0 }
   0x7   :  { %18 = vsyncpa [#allocation6 + $0x1], 0 }
   0x8   :  { %19 = vsyncpa [#allocation9], 0 }
   0x9   :  { %20 = vsyncpa [#allocation4], 0 }
   0xa   :  { %22 = vsyncpa [#allocation4 + $0x1], 0 }
   0xb   :  { %23 = vsyncpa [#allocation12], 0 }
   0xc   :  { %25 = vsyncpa [#allocation12 + $0x1], 0  ;;  %s1978_s24 = smov 0   ;;  %s1980_s25 = smov 0  }
   0xd   :  { %s1982_s26 = smov 0   ;;  %s1984_s27 = smov 0  }
   0xe   :  { %s1986_s28 = smov 0   ;;  %s1988_s29 = smov 0  }
   0xf LB: > { %2437 = sst [smem:[#allocation19_spill]] %s1914_s26  ;;  %s2009_s30 = sadd.s32 4294967295, %s1926_s29   ;;  %s1926_s29 = sphi %s1988_s29, %s31_s29   ;;  %s1922_s28 = sphi %s1986_s28, %s2466_s28   ;;  %s1918_s27 = sphi %s1984_s27, %s2465_s27   ;;  %s1914_s26 = sphi %s1982_s26, %s2469_s26   ;;  %s1910_s25 = sphi %s1980_s25, %s2468_s25   ;;  %s1906_s24 = sphi %s1978_s24, %s2467_s24  }
  0x10   : > { %2438 = sst [smem:[#allocation20_spill]] %s1922_s28  ;;  %s1237_s8 = sadd.s32 4294967294, %s1926_s29  }
  0x11   : > { %p65_p0 = scmp.ne.s32.totalorder %s1910_s25, %s1906_s24  ;;  %p2423_p1 = scmp.eq.s32.totalorder %s2009_s30, 0 }
  0x12   : > { %p209_p3 = scmp.eq.s32.totalorder %s1237_s8, 1  ;;  %p1238_p5 = scmp.ge.s32.totalorder %s1926_s29, 1 }
  0x13   : > { %p2018_p4 = por %p2423_p1, %p65_p0  ;;  %p244_p7 = scmp.lt.s32.totalorder %s1926_s29, 3 }
  0x14   : > { %p2023_p6 = por %p209_p3, %p65_p0  ;;  %s1928_s12 = smov [#allocation7]  }
  0x15   : > { %s2439_s9 = scalar_select %p2018_p4, 1, 0 }
  0x16   : > { %s2440_s10 = scalar_select %p2023_p6, 1, 0 }
  0x17   : > { %p2028_p8 = pnand %p1238_p5, %p244_p7  ;;  %s256_s13 = sshll.u32 %s1928_s12, 4  ;;  %s2032_s13 = int_to_ptr.vmem [resolvable:$true] %s256_s13 }
  0x18   : > { %2441 = sst [smem:[#allocation21_spill]] %s2440_s10  ;;  %s1929_s15 = smov [#allocation8]  }
  0x19   : > { %p1571_p9 = pneg %p2028_p8  ;;  %s272_s16 = sshll.u32 %s1929_s15, 4  ;;  %s2043_s16 = int_to_ptr.vmem [resolvable:$true] %s272_s16 }
  0x1a   : > { %s2444_s2 = sld [smem:[#allocation25_spill]] }
  0x1b   : > { %p2039_p11 = pnand %p1571_p9, %p2423_p1 }
  0x1d   : > { %p1686_p13 = pneg %p2039_p11 }
  0x20   : > { %s1684_s19 = scalar_lea.hbm %s2444_s2, 1024 }
  0x21   : > { %p1685_p12 = scmp.ne.s32.totalorder %s2444_s2, %s1684_s19  ;;  %p1691_p5 = scmp.lt.u32.totalorder %s1684_s19, %s2444_s2 }
  0x23   : > { %p1687_p0 = pnand %p1686_p13, %p1685_p12 }
  0x25   : > { %p1688_p3 = pneg %p1687_p0 }
  0x27   : > { %p1693_p7 = pnand %p1691_p5, %p1688_p3 }
  0x29   : > { %1696 = shalt.err (!%p1693_p7)
}
  0x2a   : > { %s1697_s8 = scalar_lea.vmem %s2032_s13, 1024  ;;  %p1705_p2 = scmp.lt.s32.totalorder %s2032_s13, %s2032_s13 }
  0x2b   : > { %p1698_p9 = scmp.ne.s32.totalorder %s2032_s13, %s1697_s8  ;;  %p1706_p12 = scmp.lt.s32.totalorder %s1697_s8, %s1697_s8 }
  0x2d   : > { %p1700_p10 = pnand %p1698_p9, %p1686_p13  ;;  %p1707_p0 = por %p1706_p12, %p1705_p2 }
  0x2f   : > { %p1701_p1 = pneg %p1700_p10 }
  0x31   : > { %p1708_p6 = pnand %p1707_p0, %p1701_p1 }
  0x33   : > { %1711 = shalt.err (!%p1708_p6)
}
  0x34   : > { %s2425_s12 = smov 64   ;;  %s2427_s15 = smov 4  }
  0x35   : > { %1574 = dma.hbm_to_vmem [thread:$0]  (!%p2039_p11), %s2444_s2, 1024, %s2032_s13, [#allocation6], %s2425_s12, %s2425_s12, %s2427_s15  }
  0x36   : > { %s2445_s4 = sld [smem:[#allocation26_spill]] }
  0x3c   : > { %s1712_s21 = scalar_lea.hbm %s2445_s4, 1024 }
  0x3d   : > { %p1713_p1 = scmp.ne.s32.totalorder %s2445_s4, %s1712_s21  ;;  %p1719_p10 = scmp.lt.u32.totalorder %s1712_s21, %s2445_s4 }
  0x3f   : > { %p1715_p2 = pnand %p1713_p1, %p1686_p13 }
  0x41   : > { %p1716_p6 = pneg %p1715_p2 }
  0x43   : > { %p1721_p3 = pnand %p1719_p10, %p1716_p6 }
  0x45   : > { %1724 = shalt.err (!%p1721_p3)
}
  0x46   : > { %s1725_s13 = scalar_lea.vmem %s2043_s16, 1024  ;;  %p1733_p12 = scmp.lt.s32.totalorder %s2043_s16, %s2043_s16 }
  0x47   : > { %p1726_p5 = scmp.ne.s32.totalorder %s2043_s16, %s1725_s13  ;;  %p1734_p0 = scmp.lt.s32.totalorder %s1725_s13, %s1725_s13 }
  0x49   : > { %p1728_p7 = pnand %p1726_p5, %p1686_p13  ;;  %p1735_p1 = por %p1734_p0, %p1733_p12 }
  0x4b   : > { %p1729_p9 = pneg %p1728_p7 }
  0x4d   : > { %p1736_p2 = pnand %p1735_p1, %p1729_p9 }
  0x4f   : > { %1739 = shalt.err (!%p1736_p2)
}
  0x50   : > { %1577 = dma.hbm_to_vmem [thread:$0]  (!%p2039_p11), %s2445_s4, 1024, %s2043_s16, [#allocation9], %s2425_s12, %s2425_s12, %s2427_s15  }
  0x51   : > { %s43_s14 = sadd.s32 1, %s1922_s28  ;;  %s52_s18 = sadd.s32 1, %s1914_s26 }
  0x52   : > { %p45_p13 = scmp.ge.s32.totalorder %s43_s14, 2  ;;  %p59_p6 = scmp.ne.s32.totalorder %s1914_s26, %s1910_s25 }
  0x53   : > { %p60_p10 = scmp.eq.s32.totalorder %s1926_s29, 0  ;;  %p1594_p3 = scmp.lt.s32.totalorder %s1926_s29, 2 }
  0x54   : > { %s2471_s14 = smov (%p45_p13, %s43_s14), 0  ;;  %p2447_p7 = scmp.eq.s32.totalorder %s2009_s30, 1 }
  0x55   : > { %2446 = sst [smem:[#allocation22_spill]] %s2471_s14  ;;  %p61_p5 = por %p60_p10, %p59_p6 }
  0x56   : > { %p2113_p9 = por %p2447_p7, %p59_p6  ;;  %s47_s20 = ssub.s32 %s1922_s28, %s2471_s14 }
  0x57   : > { %s289_s21 = sand.u32 1, %s1914_s26   ;;  %p50_p12 = scmp.eq.s32.totalorder %s47_s20, 0 }
  0x58   : > { %s2448_s19 = scalar_select %p2113_p9, 1, 0 }
  0x59   : > { %s2120_s16 = sshll.u32 %s289_s21, 6  ;;  %s1329_s22 = sshll.u32 %s1922_s28, 10 }
  0x5a   : > { %s2124_s23 = scalar_select %p50_p12, %s1914_s26, %s52_s18  }
  0x5b   : > { %s2450_s0 = sld [smem:[#allocation24_spill]]  ;;  %s293_s17 = scalar_lea.vmem [#allocation2], %s2120_s16 }
  0x5c   : > { %2449 = sst [smem:[#allocation23_spill]] %s2124_s23  ;;  %s302_s12 = sshll.u32 %s293_s17, 4  ;;  %s2138_s12 = int_to_ptr.vmem [resolvable:$true] %s302_s12 }
  0x5d   : > { %p2134_p11 = pnand %p1594_p3, %p61_p5  ;;  %s2143_s8 = scalar_lea.hbm %s2416_s1, %s1329_s22 }
  0x5e   : > { %s2145_s13 = scalar_lea.sflag [#allocation3], %s289_s21 }
  0x5f   : > { %p1742_p1 = pneg %p2134_p11 }
  0x61   : > { %s2129_s10 = scalar_lea.hbm %s2450_s0, %s1329_s22  ;;  %s1745_s14 = scalar_lea.hbm %s2450_s0, 2048 }
  0x62   : > { %s1740_s2 = scalar_lea.hbm %s2129_s10, 1024  ;;  %p1746_p6 = scmp.lt.u32.totalorder %s2129_s10, %s2450_s0 }
  0x63   : > { %p1741_p0 = scmp.ne.s32.totalorder %s2129_s10, %s1740_s2  ;;  %p1747_p10 = scmp.lt.u32.totalorder %s1745_s14, %s1740_s2 }
  0x64   : > { %p1749_p5 = scmp.lt.u32.totalorder %s1740_s2, %s2129_s10 }
  0x65   : > { %p1743_p2 = pnand %p1742_p1, %p1741_p0  ;;  %p1748_p3 = por %p1747_p10, %p1746_p6 }
  0x67   : > { %p1744_p13 = pneg %p1743_p2  ;;  %p1750_p7 = por %p1749_p5, %p1748_p3 }
  0x69   : > { %p1751_p12 = pnand %p1750_p7, %p1744_p13 }
  0x6b   : > { %1754 = shalt.err (!%p1751_p12)
}
  0x6c   : > { %s1755_s15 = scalar_lea.vmem %s2138_s12, 1024  ;;  %s1932_s4 = smov [#allocation2]  }
  0x6d   : > { %p1756_p0 = scmp.ne.s32.totalorder %s2138_s12, %s1755_s15  ;;  %s1760_s21 = sshll.u32 %s1932_s4, 4  ;;  %s1761_s21 = int_to_ptr.vmem [resolvable:$false] %s1760_s21 }
  0x6e   : > { %s1762_s28 = scalar_lea.vmem %s1761_s21, 2048  ;;  %p1763_p4 = scmp.lt.s32.totalorder %s2138_s12, %s1761_s21 }
  0x6f   : > { %p1758_p2 = pnand %p1756_p0, %p1742_p1  ;;  %p1764_p6 = scmp.lt.s32.totalorder %s1762_s28, %s1755_s15 }
  0x71   : > { %p1759_p9 = pneg %p1758_p2  ;;  %p1765_p10 = por %p1764_p6, %p1763_p4 }
  0x73   : > { %p1766_p3 = pnand %p1765_p10, %p1759_p9 }
  0x75   : > { %1769 = shalt.err (!%p1766_p3)
}
  0x76   : > { %s2452_s2 = smov 4   ;;  %s2453_s14 = smov 64  }
  0x77   : > { %1581 = dma.hbm_to_vmem [thread:$0]  (!%p2134_p11), %s2129_s10, 1024, %s2138_s12, %s2145_s13, %s2453_s14, %s2453_s14, %s2452_s2  }
  0x78   : > { %s316_s22 = scalar_lea.vmem [#allocation5], %s2120_s16  ;;  %s312_s18 = sand.u32 1, %s1926_s29  }
  0x79   : > { %s325_s23 = sshll.u32 %s316_s22, 4  ;;  %s2180_s17 = scalar_lea.sflag [#allocation6], %s312_s18  ;;  %s2178_s23 = int_to_ptr.vmem [resolvable:$true] %s325_s23 }
  0x7a   : > { %s1770_s15 = scalar_lea.hbm %s2143_s8, 1024  ;;  %s1775_s28 = scalar_lea.hbm %s2416_s1, 2048 }
  0x7b   : > { %p1771_p4 = scmp.ne.s32.totalorder %s2143_s8, %s1770_s15  ;;  %p1776_p5 = scmp.lt.u32.totalorder %s2143_s8, %s2416_s1 }
  0x7c   : > { %p1777_p7 = scmp.lt.u32.totalorder %s1775_s28, %s1770_s15  ;;  %p1779_p0 = scmp.lt.u32.totalorder %s1770_s15, %s2143_s8 }
  0x7d   : > { %p1773_p9 = pnand %p1771_p4, %p1742_p1 }
  0x7e   : > { %p1778_p12 = por %p1777_p7, %p1776_p5 }
  0x7f   : > { %p1774_p13 = pneg %p1773_p9 }
  0x80   : > { %p1780_p2 = por %p1779_p0, %p1778_p12 }
  0x82   : > { %p1781_p6 = pnand %p1780_p2, %p1774_p13 }
  0x84   : > { %1784 = shalt.err (!%p1781_p6)
}
  0x85   : > { %s1785_s12 = scalar_lea.vmem %s2178_s23, 1024  ;;  %s1933_s16 = smov [#allocation5]  }
  0x86   : > { %p1786_p10 = scmp.ne.s32.totalorder %s2178_s23, %s1785_s12  ;;  %s1790_s10 = sshll.u32 %s1933_s16, 4  ;;  %s1791_s10 = int_to_ptr.vmem [resolvable:$false] %s1790_s10 }
  0x87   : > { %s1792_s0 = scalar_lea.vmem %s1791_s10, 2048  ;;  %p1793_p9 = scmp.lt.s32.totalorder %s2178_s23, %s1791_s10 }
  0x88   : > { %p1788_p3 = pnand %p1786_p10, %p1742_p1  ;;  %p1794_p5 = scmp.lt.s32.totalorder %s1792_s0, %s1785_s12 }
  0x8a   : > { %p1789_p4 = pneg %p1788_p3  ;;  %p1795_p7 = por %p1794_p5, %p1793_p9 }
  0x8c   : > { %p1796_p12 = pnand %p1795_p7, %p1789_p4 }
  0x8e   : > { %1799 = shalt.err (!%p1796_p12)
}
  0x8f   : > { %1584 = dma.hbm_to_vmem [thread:$0]  (!%p2134_p11), %s2143_s8, 1024, %s2178_s23, %s2180_s17, %s2453_s14, %s2453_s14, %s2452_s2  }
  0x90   : > { %337 = sbr.rel (%p2028_p8) target bundleno = 476 (0x1dc), region = 44  ;;  %s2212_s26 = sand.u32 (!%p2028_p8), 1, %s1910_s25  }
  0x91   : > { %s2215_s13 = sshll.u32 (!%p2028_p8), %s2212_s26, 6  ;;  %s340_s20 = scalar_lea.sflag (!%p2028_p8), [#allocation3], %s2212_s26 }
  0x92   : > { %s2219_s22 = scalar_lea.vmem (!%p2028_p8), [#allocation2], %s2215_s13  ;;  %p2454_p1 = scmp.ne.s32.totalorder (!%p2028_p8), %s2439_s9, 0 }
  0x97   : > { %1881 = dma.done.wait (%p2454_p1), %s340_s20, 1024  }
  0x98   : > { %1883 = vsyncadd (%p2454_p1), %s340_s20, 4294966272  ;;  %s348_s11 = sand.u32 1, %s2009_s30   ;;  %s2227_s2 = scalar_lea.vmem [#allocation5], %s2215_s13 }
  0x99   : > { %s349_s8 = scalar_lea.sflag [#allocation6], %s348_s11 }
  0x9a   : > { %1885 = dma.done.wait (%p2454_p1), %s349_s8, 1024  }
  0x9b   : > { %1887 = vsyncadd (%p2454_p1), %s349_s8, 4294966272  ;;  %p2455_p8 = scmp.eq.s32.totalorder %s2009_s30, 0 }
  0x9d   : > { %1889 = dma.done.wait (%p2455_p8), [#allocation6], 1024   ;;  %p2456_p11 = pmov %p2455_p8 }
  0x9e   : > { %p2457_p13 = pmov %p2455_p8 }
  0x9f   : > { %1891 = vsyncadd (%p2456_p11), [#allocation6], 4294966272 }
  0xa0   : > { %1893 = dma.done.wait (%p2457_p13), [#allocation9], 1024   ;;  %p2458_p0 = pmov %p2455_p8 }
  0xa1   : > { %v1652_v0 = vld [vmem:[#allocation7] sm:$0xff]   ;;  %v1654_v2 = vld [vmem:[#allocation7 + $0x8] sm:$0xff]   ;;  %v1656_v4 = vld [vmem:[#allocation7 + $0x10] sm:$0xff]   ;;  %s2276_s18 = scalar_lea.vmem [#allocation10], %s2215_s13  ;;  %s2280_s17 = scalar_lea.vmem [#allocation11], %s2215_s13 }
  0xa2   : > { %1895 = vsyncadd (%p2458_p0), [#allocation9], 4294966272  ;;  %v1653_v1 = vld [vmem:[#allocation8] sm:$0xff]   ;;  %1491 = vmatprep.subr.bf16.mxu0 %v1652_v0  ;;  %v1655_v3 = vld [vmem:[#allocation8 + $0x8] sm:$0xff]   ;;  %s1051_s15 = sshll.u32 %s2276_s18, 4  ;;  %s1069_s4 = sshll.u32 %s2280_s17, 4  ;;  %s2314_s15 = int_to_ptr.vmem [resolvable:$true] %s1051_s15  ;;  %s2316_s4 = int_to_ptr.vmem [resolvable:$true] %s1069_s4 }
  0xa3   : > { %1523 = vmatprep.subr.bf16.mxu1 %v1653_v1  ;;  %1492 = vmatpush3.bf16.msra.mxu0 %v1652_v0  ;;  %v1657_v5 = vld [vmem:[#allocation8 + $0x10] sm:$0xff]   ;;  %v1658_v6 = vld [vmem:[#allocation7 + $0x18] sm:$0xff]   ;;  %v1660_v8 = vld [vmem:[#allocation7 + $0x20] sm:$0xff]   ;;  %s1363_s21 = sshll.u32 %s1918_s27, 10  ;;  %s1031_s13 = scalar_lea.sflag [#allocation4], %s2212_s26 }
  0xa4   : > { %1524 = vmatpush3.bf16.msra.mxu1 %v1653_v1  ;;  %1493 = vmatprep.subr.bf16.mxu0 %v1654_v2  ;;  %v1659_v7 = vld [vmem:[#allocation8 + $0x18] sm:$0xff]   ;;  %v1661_v9 = vld [vmem:[#allocation8 + $0x20] sm:$0xff]   ;;  %v1662_v10 = vld [vmem:[#allocation7 + $0x28] sm:$0xff]   ;;  %s2327_s12 = scalar_lea.hbm %s2421_s6, %s1363_s21  ;;  %s2333_s0 = scalar_lea.hbm %s2422_s7, %s1363_s21 }
  0xa5   : > { %1525 = vmatprep.subr.bf16.mxu1 %v1655_v3  ;;  %v1663_v11 = vld [vmem:[#allocation8 + $0x28] sm:$0xff]   ;;  %v1668_v12 = vld [vmem:[%s2219_s22] sm:$0xff]   ;;  %v1664_v14 = vld [vmem:[#allocation7 + $0x30] sm:$0xff]   ;;  %s1800_s20 = scalar_lea.vmem %s2314_s15, 1024  ;;  %p2459_p6 = scmp.ne.s32.totalorder %s2448_s19, 0 }
  0xa6   : > { %v1669_v13 = vld [vmem:[%s2227_s2] sm:$0xff]   ;;  %1507 = vmatprep.mubr.bf16.mxu0 %v1668_v12  ;;  %v1665_v15 = vld [vmem:[#allocation8 + $0x30] sm:$0xff]   ;;  %v1666_v16 = vld [vmem:[#allocation7 + $0x38] sm:$0xff]   ;;  %p1801_p2 = scmp.ne.s32.totalorder %s2314_s15, %s1800_s20 }
  0xa7   : > { %1494 = vmatpush3.bf16.msra.mxu0 %v1654_v2  ;;  %1539 = vmatprep.mubr.bf16.mxu1 %v1669_v13  ;;  %v1667_v17 = vld [vmem:[#allocation8 + $0x38] sm:$0xff]   ;;  %v1670_v18 = vld [vmem:[%s2219_s22 + $0x8] sm:$0xff]   ;;  %v1672_v20 = vld [vmem:[%s2219_s22 + $0x10] sm:$0xff]  }
  0xa8   : > { %1526 = vmatpush3.bf16.msra.mxu1 %v1655_v3  ;;  %1495 = vmatprep.subr.bf16.mxu0 %v1656_v4  ;;  %v1671_v19 = vld [vmem:[%s2227_s2 + $0x8] sm:$0xff]   ;;  %v1673_v21 = vld [vmem:[%s2227_s2 + $0x10] sm:$0xff]   ;;  %v1674_v22 = vld [vmem:[%s2219_s22 + $0x18] sm:$0xff]   ;;  %p1802_p10 = pnand %p1801_p2, %p2459_p6 }
  0xa9   : > { %1527 = vmatprep.subr.bf16.mxu1 %v1657_v5  ;;  %v1675_v23 = vld [vmem:[%s2227_s2 + $0x18] sm:$0xff]   ;;  %v1676_v24 = vld [vmem:[%s2219_s22 + $0x20] sm:$0xff]   ;;  %v1678_v26 = vld [vmem:[%s2219_s22 + $0x28] sm:$0xff]  }
  0xaa   : > { %v1677_v25 = vld [vmem:[%s2227_s2 + $0x20] sm:$0xff]   ;;  %v1679_v27 = vld [vmem:[%s2227_s2 + $0x28] sm:$0xff]   ;;  %v1680_v28 = vld [vmem:[%s2219_s22 + $0x30] sm:$0xff]   ;;  %p1803_p3 = pneg %p1802_p10 }
  0xab   : > { %1496 = vmatpush3.bf16.msra.mxu0 %v1656_v4  ;;  %v1681_v29 = vld [vmem:[%s2227_s2 + $0x30] sm:$0xff]   ;;  %v1682_v30 = vld [vmem:[%s2219_s22 + $0x38] sm:$0xff]   ;;  %v2260_v33 = vld [vmem:[%s2418_s3] ss:$0 sm:$0xff]  ;;  %s1934_s22 = smov [#allocation10]  }
  0xac   : > { %1528 = vmatpush3.bf16.msra.mxu1 %v1657_v5  ;;  %1497 = vmatprep.subr.bf16.mxu0 %v1658_v6  ;;  %v1683_v31 = vld [vmem:[%s2227_s2 + $0x38] sm:$0xff]   ;;  %v2265_v35 = vld [vmem:[%s2420_s5] ss:$0 sm:$0xff]  ;;  %s1804_s11 = sshll.u32 %s1934_s22, 4  ;;  %s1805_s11 = int_to_ptr.vmem [resolvable:$false] %s1804_s11 }
  0xad   : > { %1529 = vmatprep.subr.bf16.mxu1 %v1659_v7  ;;  %s1806_s8 = scalar_lea.vmem %s1805_s11, 2048  ;;  %p1807_p4 = scmp.lt.s32.totalorder %s2314_s15, %s1805_s11 }
  0xae   : > { %p1808_p9 = scmp.lt.s32.totalorder %s1806_s8, %s1800_s20 }
  0xaf   : > { %1498 = vmatpush3.bf16.msra.mxu0 %v1658_v6 }
  0xb0   : > { %1530 = vmatpush3.bf16.msra.mxu1 %v1659_v7  ;;  %1499 = vmatprep.subr.bf16.mxu0 %v1660_v8  ;;  %p1809_p5 = por %p1808_p9, %p1807_p4 }
  0xb1   : > { %1531 = vmatprep.subr.bf16.mxu1 %v1661_v9 }
  0xb2   : > { %p1810_p7 = pnand %p1809_p5, %p1803_p3 }
  0xb3   : > { %1500 = vmatpush3.bf16.msra.mxu0 %v1660_v8 }
  0xb4   : > { %1532 = vmatpush3.bf16.msra.mxu1 %v1661_v9  ;;  %1501 = vmatprep.subr.bf16.mxu0 %v1662_v10 }
  0xb5   : > { %1533 = vmatprep.subr.bf16.mxu1 %v1663_v11 }
  0xb7   : > { %1502 = vmatpush3.bf16.msra.mxu0 %v1662_v10 }
  0xb8   : > { %1534 = vmatpush3.bf16.msra.mxu1 %v1663_v11  ;;  %1503 = vmatprep.subr.bf16.mxu0 %v1664_v14 }
  0xb9   : > { %1535 = vmatprep.subr.bf16.mxu1 %v1665_v15 }
  0xbb   : > { %1504 = vmatpush3.bf16.msra.mxu0 %v1664_v14 }
  0xbc   : > { %1536 = vmatpush3.bf16.msra.mxu1 %v1665_v15  ;;  %1505 = vmatprep.subr.bf16.mxu0 %v1666_v16 }
  0xbd   : > { %1537 = vmatprep.subr.bf16.mxu1 %v1667_v17 }
  0xbf   : > { %1506 = vmatpush3.bf16.msra.mxu0 %v1666_v16 }
  0xc0   : > { %1538 = vmatpush3.bf16.msra.mxu1 %v1667_v17 }
  0xc2   : > { %1508 = vmatmul.mubr.bf16.vlgmr.msra.gmra.mrb[0].mxu0 %v1670_v18 }
  0xc3   : > { %1540 = vmatmul.mubr.bf16.vlgmr.msra.gmra.mrb[0].mxu1 %v1671_v19  ;;  %1511 = vmatprep.mubr.bf16.mxu0 %v1672_v20 }
  0xc4   : > { %1543 = vmatprep.mubr.bf16.mxu1 %v1673_v21 }
  0xca   : > { %1512 = vmatmul.mubr.bf16.gmra.mrb[4].mxu0 %v1674_v22 }
  0xcb   : > { %1544 = vmatmul.mubr.bf16.gmra.mrb[4].mxu1 %v1675_v23  ;;  %1515 = vmatprep.mubr.bf16.mxu0 %v1676_v24 }
  0xcc   : > { %1547 = vmatprep.mubr.bf16.mxu1 %v1677_v25 }
  0xd2   : > { %1516 = vmatmul.mubr.bf16.gmra.mrb[8].mxu0 %v1678_v26 }
  0xd3   : > { %1548 = vmatmul.mubr.bf16.gmra.mrb[8].mxu1 %v1679_v27  ;;  %1519 = vmatprep.mubr.bf16.mxu0 %v1680_v28 }
  0xd4   : > { %1551 = vmatprep.mubr.bf16.mxu1 %v1681_v29 }
  0xda   : > { %1520 = vmatmul.mubr.bf16.gmra.mrb[12].mxu0 %v1682_v30 }
  0xdb   : > { %1552 = vmatmul.mubr.bf16.gmra.mrb[12].mxu1 %v1683_v31 }
 0x195   : > { %v1509_v32 = vpop.f32.mrb[0].mxu0 }
 0x196   : > { %v1541_v34 = vpop.f32.mrb[0].mxu1  ;;  %v575_v36 = vpop.f32.mrb[1].mxu0  ;;  %v584_v39 = vadd.f32 %v1509_v32, %v2260_v33 }
 0x197   : > { %v807_v37 = vpop.f32.mrb[1].mxu1  ;;  %v1510_v38 = vpop.f32.mrb[2].mxu0  ;;  %v816_v43 = vadd.f32 %v1541_v34, %v2265_v35  ;;  %v576_v44 = vadd.f32 %v2260_v33, %v575_v36 }
 0x198   : > { %v587_v40 = vadd.f32 %v1510_v38, %v2260_v33  ;;  %v1542_v41 = vpop.f32.mrb[2].mxu1  ;;  %v578_v42 = vpop.f32.mrb[3].mxu0  ;;  %v808_v48 = vadd.f32 %v2265_v35, %v807_v37 }
 0x199   : > { %v819_v45 = vadd.f32 %v1542_v41, %v2265_v35  ;;  %v579_v46 = vadd.f32 %v2260_v33, %v578_v42  ;;  %v810_v47 = vpop.f32.mrb[3].mxu1 }
 0x19a   : > { %v1373_v49 = vpack.c.bf16 %v587_v40, %v584_v39  ;;  %v811_v50 = vadd.f32 %v2265_v35, %v810_v47 }
 0x19b   : > { %v1413_v51 = vpack.c.bf16 %v819_v45, %v816_v43  ;;  %v1368_v52 = vpack.c.bf16 %v579_v46, %v576_v44 }
 0x19c   : > { %1445 = vst [vmem:[%s2276_s18 + $0x8] sm:$0xff] %v1373_v49   ;;  %v1408_v53 = vpack.c.bf16 %v811_v50, %v808_v48 }
 0x19d   : > { %1452 = vst [vmem:[%s2280_s17 + $0x8] sm:$0xff] %v1413_v51   ;;  %1369 = vst [vmem:[%s2276_s18] sm:$0xff] %v1368_v52   ;;  %v1513_v54 = vpop.f32.mrb[4].mxu0 }
 0x19e   : > { %1409 = vst [vmem:[%s2280_s17] sm:$0xff] %v1408_v53   ;;  %v1545_v55 = vpop.f32.mrb[4].mxu1  ;;  %v591_v56 = vpop.f32.mrb[5].mxu0  ;;  %v600_v59 = vadd.f32 %v1513_v54, %v2260_v33 }
 0x19f   : > { %v823_v57 = vpop.f32.mrb[5].mxu1  ;;  %v1514_v58 = vpop.f32.mrb[6].mxu0  ;;  %v832_v63 = vadd.f32 %v1545_v55, %v2265_v35  ;;  %v592_v0 = vadd.f32 %v2260_v33, %v591_v56 }
 0x1a0   : > { %v603_v60 = vadd.f32 %v1514_v58, %v2260_v33  ;;  %v1546_v61 = vpop.f32.mrb[6].mxu1  ;;  %v594_v62 = vpop.f32.mrb[7].mxu0  ;;  %v824_v4 = vadd.f32 %v2265_v35, %v823_v57 }
 0x1a1   : > { %v835_v1 = vadd.f32 %v1546_v61, %v2265_v35  ;;  %v595_v2 = vadd.f32 %v2260_v33, %v594_v62  ;;  %v826_v3 = vpop.f32.mrb[7].mxu1 }
 0x1a2   : > { %v1383_v5 = vpack.c.bf16 %v603_v60, %v600_v59  ;;  %v827_v6 = vadd.f32 %v2265_v35, %v826_v3 }
 0x1a3   : > { %v1423_v7 = vpack.c.bf16 %v835_v1, %v832_v63  ;;  %v1378_v8 = vpack.c.bf16 %v595_v2, %v592_v0 }
 0x1a4   : > { %1447 = vst [vmem:[%s2276_s18 + $0x18] sm:$0xff] %v1383_v5   ;;  %v1418_v9 = vpack.c.bf16 %v827_v6, %v824_v4 }
 0x1a5   : > { %1454 = vst [vmem:[%s2280_s17 + $0x18] sm:$0xff] %v1423_v7   ;;  %1446 = vst [vmem:[%s2276_s18 + $0x10] sm:$0xff] %v1378_v8   ;;  %v1517_v10 = vpop.f32.mrb[8].mxu0 }
 0x1a6   : > { %1453 = vst [vmem:[%s2280_s17 + $0x10] sm:$0xff] %v1418_v9   ;;  %v1549_v11 = vpop.f32.mrb[8].mxu1  ;;  %v607_v12 = vpop.f32.mrb[9].mxu0  ;;  %v616_v15 = vadd.f32 %v1517_v10, %v2260_v33 }
 0x1a7   : > { %v839_v13 = vpop.f32.mrb[9].mxu1  ;;  %v1518_v14 = vpop.f32.mrb[10].mxu0  ;;  %v848_v19 = vadd.f32 %v1549_v11, %v2265_v35  ;;  %v608_v20 = vadd.f32 %v2260_v33, %v607_v12 }
 0x1a8   : > { %v619_v16 = vadd.f32 %v1518_v14, %v2260_v33  ;;  %v1550_v17 = vpop.f32.mrb[10].mxu1  ;;  %v610_v18 = vpop.f32.mrb[11].mxu0  ;;  %v840_v24 = vadd.f32 %v2265_v35, %v839_v13 }
 0x1a9   : > { %v851_v21 = vadd.f32 %v1550_v17, %v2265_v35  ;;  %v611_v22 = vadd.f32 %v2260_v33, %v610_v18  ;;  %v842_v23 = vpop.f32.mrb[11].mxu1 }
 0x1aa   : > { %v1393_v25 = vpack.c.bf16 %v619_v16, %v616_v15  ;;  %v843_v26 = vadd.f32 %v2265_v35, %v842_v23 }
 0x1ab   : > { %v1433_v27 = vpack.c.bf16 %v851_v21, %v848_v19  ;;  %v1388_v28 = vpack.c.bf16 %v611_v22, %v608_v20 }
 0x1ac   : > { %1449 = vst [vmem:[%s2276_s18 + $0x28] sm:$0xff] %v1393_v25   ;;  %v1428_v29 = vpack.c.bf16 %v843_v26, %v840_v24 }
 0x1ad   : > { %1456 = vst [vmem:[%s2280_s17 + $0x28] sm:$0xff] %v1433_v27   ;;  %1448 = vst [vmem:[%s2276_s18 + $0x20] sm:$0xff] %v1388_v28   ;;  %v1521_v30 = vpop.f32.mrb[12].mxu0 }
 0x1ae   : > { %1455 = vst [vmem:[%s2280_s17 + $0x20] sm:$0xff] %v1428_v29   ;;  %v1553_v31 = vpop.f32.mrb[12].mxu1  ;;  %v623_v32 = vpop.f32.mrb[13].mxu0  ;;  %v632_v37 = vadd.f32 %v1521_v30, %v2260_v33 }
 0x1af   : > { %v855_v34 = vpop.f32.mrb[13].mxu1  ;;  %v1522_v36 = vpop.f32.mrb[14].mxu0  ;;  %v864_v41 = vadd.f32 %v1553_v31, %v2265_v35  ;;  %v624_v42 = vadd.f32 %v2260_v33, %v623_v32 }
 0x1b0   : > { %v635_v38 = vadd.f32 %v1522_v36, %v2260_v33  ;;  %v1554_v39 = vpop.f32.mrb[14].mxu1  ;;  %v626_v40 = vpop.f32.mrb[15].mxu0  ;;  %v856_v46 = vadd.f32 %v2265_v35, %v855_v34 }
 0x1b1   : > { %v867_v43 = vadd.f32 %v1554_v39, %v2265_v35  ;;  %v627_v44 = vadd.f32 %v2260_v33, %v626_v40  ;;  %v858_v45 = vpop.f32.mrb[15].mxu1 }
 0x1b2   : > { %v1403_v47 = vpack.c.bf16 %v635_v38, %v632_v37  ;;  %v859_v48 = vadd.f32 %v2265_v35, %v858_v45 }
 0x1b3   : > { %v1443_v49 = vpack.c.bf16 %v867_v43, %v864_v41  ;;  %v1398_v50 = vpack.c.bf16 %v627_v44, %v624_v42 }
 0x1b4   : > { %1451 = vst [vmem:[%s2276_s18 + $0x38] sm:$0xff] %v1403_v47   ;;  %v1438_v51 = vpack.c.bf16 %v859_v48, %v856_v46 }
 0x1b5   : > { %1458 = vst [vmem:[%s2280_s17 + $0x38] sm:$0xff] %v1443_v49   ;;  %1450 = vst [vmem:[%s2276_s18 + $0x30] sm:$0xff] %v1398_v50  }
 0x1b6   : > { %1457 = vst [vmem:[%s2280_s17 + $0x30] sm:$0xff] %v1438_v51  }
 0x1b7   : > { %1813 = shalt.err (!%p1810_p7)
}
 0x1b8   : > { %s1814_s2 = scalar_lea.hbm %s2327_s12, 1024  ;;  %s1818_s14 = scalar_lea.hbm %s2421_s6, 2048 }
 0x1b9   : > { %p1815_p12 = scmp.ne.s32.totalorder %s2327_s12, %s1814_s2  ;;  %p1819_p11 = scmp.lt.u32.totalorder %s2327_s12, %s2421_s6 }
 0x1ba   : > { %p1820_p13 = scmp.lt.u32.totalorder %s1818_s14, %s1814_s2  ;;  %p1822_p2 = scmp.lt.u32.totalorder %s1814_s2, %s2327_s12 }
 0x1bb   : > { %p1816_p1 = pnand %p1815_p12, %p2459_p6 }
 0x1bc   : > { %p1821_p0 = por %p1820_p13, %p1819_p11 }
 0x1bd   : > { %p1817_p8 = pneg %p1816_p1 }
 0x1be   : > { %p1823_p10 = por %p1822_p2, %p1821_p0 }
 0x1c0   : > { %p1824_p3 = pnand %p1823_p10, %p1817_p8 }
 0x1c2   : > { %1827 = shalt.err (!%p1824_p3)
}
 0x1c3   : > { %s1935_s17 = smov 64   ;;  %s1936_s21 = smov 4  }
 0x1c4   : > { %1567 = dma.vmem_to_hbm [thread:$0]  (%p2459_p6), %s2314_s15, 1024, %s2327_s12, %s1031_s13, %s1935_s17, %s1935_s17, %s1936_s21  }
 0x1c5   : > { %s1036_s27 = scalar_lea.sflag [#allocation12], %s2212_s26  ;;  %s1828_s28 = scalar_lea.vmem %s2316_s4, 1024 }
 0x1c6   : > { %p1829_p4 = scmp.ne.s32.totalorder %s2316_s4, %s1828_s28  ;;  %s1937_s16 = smov [#allocation11]  }
 0x1c7   : > { %s1832_s10 = sshll.u32 %s1937_s16, 4  ;;  %s1833_s10 = int_to_ptr.vmem [resolvable:$false] %s1832_s10 }
 0x1c8   : > { %p1830_p9 = pnand %p1829_p4, %p2459_p6  ;;  %s1834_s20 = scalar_lea.vmem %s1833_s10, 2048 }
 0x1c9   : > { %p1835_p7 = scmp.lt.s32.totalorder %s2316_s4, %s1833_s10  ;;  %p1836_p12 = scmp.lt.s32.totalorder %s1834_s20, %s1828_s28 }
 0x1ca   : > { %p1831_p5 = pneg %p1830_p9 }
 0x1cb   : > { %p1837_p1 = por %p1836_p12, %p1835_p7 }
 0x1cd   : > { %p1838_p8 = pnand %p1837_p1, %p1831_p5 }
 0x1cf   : > { %1841 = shalt.err (!%p1838_p8)
}
 0x1d0   : > { %s1842_s15 = scalar_lea.hbm %s2333_s0, 1024  ;;  %s1846_s22 = scalar_lea.hbm %s2422_s7, 2048 }
 0x1d1   : > { %p1843_p11 = scmp.ne.s32.totalorder %s2333_s0, %s1842_s15  ;;  %p1847_p2 = scmp.lt.u32.totalorder %s2333_s0, %s2422_s7 }
 0x1d2   : > { %p1848_p10 = scmp.lt.u32.totalorder %s1846_s22, %s1842_s15  ;;  %p1850_p4 = scmp.lt.u32.totalorder %s1842_s15, %s2333_s0 }
 0x1d3   : > { %p1844_p13 = pnand %p1843_p11, %p2459_p6 }
 0x1d4   : > { %p1849_p3 = por %p1848_p10, %p1847_p2 }
 0x1d5   : > { %p1845_p0 = pneg %p1844_p13 }
 0x1d6   : > { %p1851_p9 = por %p1850_p4, %p1849_p3 }
 0x1d8   : > { %p1852_p5 = pnand %p1851_p9, %p1845_p0 }
 0x1da   : > { %1855 = shalt.err (!%p1852_p5)
}
 0x1db   : > { %1568 = dma.vmem_to_hbm [thread:$0]  (%p2459_p6), %s2316_s4, 1024, %s2333_s0, %s1036_s27, %s1935_s17, %s1935_s17, %s1936_s21  }
 0x1dc PF: > { %s2460_s2 = sld [smem:[#allocation21_spill]]  ;;  %s1084_s30 = sand.u32 1, %s1906_s24  }
 0x1dd   : > { %p2462_p12 = scmp.ge.s32.totalorder %s1926_s29, 2  ;;  %s1085_s9 = scalar_lea.sflag [#allocation4], %s1084_s30 }
 0x1e2   : > { %p2461_p7 = scmp.ne.s32.totalorder %s2460_s2, 0 }
 0x1e4   : > { %p1586_p1 = pnand %p2462_p12, %p2461_p7 }
 0x1e6   : > { %1897 = dma.done.wait (!%p1586_p1), %s1085_s9, 1024  }
 0x1e7   : > { %1899 = vsyncadd (!%p1586_p1), %s1085_s9, 4294966272  ;;  %s1094_s19 = scalar_lea.sflag [#allocation12], %s1084_s30 }
 0x1e8   : > { %1901 = dma.done.wait (!%p1586_p1), %s1094_s19, 1024  }
 0x1e9   : > { %1903 = vsyncadd (!%p1586_p1), %s1094_s19, 4294966272  ;;  %s31_s29 = sadd.s32 1, %s1926_s29   ;;  %s2463_s26 = sld [smem:[#allocation19_spill]] }
 0x1ea   : > { %p28_p8 = scmp.ge.s32.totalorder %s31_s29, 4   ;;  %s2464_s4 = sld [smem:[#allocation23_spill]] }
 0x1eb   : > { %s2465_s27 = sld [smem:[#allocation20_spill]]  ;;  %s2466_s28 = sld [smem:[#allocation22_spill]] }
 0x1ec   : > { %s2467_s24 = smov %s1910_s25  ;;  %30 = sbr.rel (!%p28_p8) target bundleno = 15 (0xf), region = 127 }
 0x1ef   : > { %s2468_s25 = smov %s2463_s26 }
 0x1f0   : > { %s2469_s26 = smov %s2464_s4 }
 0x1f3   :  { %1099 = vsyncpa [#allocation3], 1 }
 0x1f4   :  { %1101 = vsyncpa [#allocation3 + $0x1], 1 }
 0x1f5   :  { %1102 = vsyncpa [#allocation6], 1 }
 0x1f6   :  { %1104 = vsyncpa [#allocation6 + $0x1], 1 }
 0x1f7   :  { %1105 = vsyncpa [#allocation9], 1 }
 0x1f8   :  { %1106 = vsyncpa [#allocation4], 1 }
 0x1f9   :  { %1108 = vsyncpa [#allocation4 + $0x1], 1 }
 0x1fa   :  { %1109 = vsyncpa [#allocation12], 1 }
 0x1fb   :  { %1111 = vsyncpa [#allocation12 + $0x1], 1 }

</bundles_post_ra>
